<compile_context>
chip_gen: v6e
topology: v6e:2x2x1
jax: 0.10.0
libtpu: 0.0.40
codegen_flags: <defaults>
</compile_context>

<pallas_src>
import functools

import jax
import jax.numpy as jnp
from jax import lax
from jax.experimental import pallas as pl
from jax.experimental.pallas import tpu as pltpu

LANE = 128                       # output-channel (lane) tile width
_VMEM_LIMIT = 32 * 1024 * 1024   # accepted on v5e/v6e/v7x; raise for huge tiles


def _round_up(v, m):
    return (v + m - 1) // m * m


def _pad_last(x, c_to):
    c = x.shape[-1]
    if c == c_to:
        return x
    return jnp.pad(x, [(0, 0)] * (x.ndim - 1) + [(0, c_to - c)])


# ----------------------------- Pallas kernels ------------------------------ #

def _conv1_kernel(xpp_ref, w_ref, scale_ref, bias_ref, o_ref, *, stride):
    """3x3 conv (stride 1 or 2) + folded BN + ReLU.

    xpp_ref : (1, s*s, Hp/s, Wp/s, Cin) f32  stride-phase-split, spatially padded
    w_ref   : (9, Cin, TN)              bf16 (kh,kw) taps flattened on dim 0
    scale/bias : (1, TN)                f32
    o_ref   : (1, Ho+2, Wo+2, TN)       f32  with a 1-px zero border (pad for conv2)
    """
    _, hop, wop, tn = o_ref.shape
    ho, wo = hop - 2, wop - 2
    cin = xpp_ref.shape[-1]
    s = stride

    acc = jnp.zeros((ho * wo, tn), jnp.float32)
    for kh in range(3):
        for kw in range(3):
            p = (kh % s) * s + (kw % s)          # which stride phase holds this tap
            patch = xpp_ref[0, p, pl.ds(kh // s, ho), pl.ds(kw // s, wo), :]
            patch = patch.astype(jnp.bfloat16).reshape(ho * wo, cin)
            acc += jnp.dot(patch, w_ref[kh * 3 + kw],
                           preferred_element_type=jnp.float32)

    y = jnp.maximum(acc * scale_ref[...] + bias_ref[...], 0.0)
    o_ref[...] = jnp.zeros(o_ref.shape, o_ref.dtype)          # zero 1-px border
    o_ref[0, 1:ho + 1, 1:wo + 1, :] = y.reshape(ho, wo, tn).astype(o_ref.dtype)


def _conv2_kernel(*refs, shortcut_conv):
    """3x3 stride-1 conv + BN, fused shortcut (1x1-stride-2 conv + BN, or
    identity), residual add and final ReLU."""
    if shortcut_conv:
        (y1p_ref, w2_ref, scale2_ref, bias2_ref,
         xres_ref, wsc_ref, scale_sc_ref, bias_sc_ref, o_ref) = refs
    else:
        y1p_ref, w2_ref, scale2_ref, bias2_ref, xres_ref, o_ref = refs

    _, ho, wo, tn = o_ref.shape
    cmid = y1p_ref.shape[-1]

    acc = jnp.zeros((ho * wo, tn), jnp.float32)
    for kh in range(3):
        for kw in range(3):
            patch = y1p_ref[0, pl.ds(kh, ho), pl.ds(kw, wo), :]
            patch = patch.astype(jnp.bfloat16).reshape(ho * wo, cmid)
            acc += jnp.dot(patch, w2_ref[kh * 3 + kw],
                           preferred_element_type=jnp.float32)
    y = acc * scale2_ref[...] + bias2_ref[...]

    if shortcut_conv:
        # 1x1 stride-2 conv shortcut: its input is exactly the last stride phase
        # of the padded input; the BlockSpec index_map already selected it.
        cin = xres_ref.shape[-1]
        xs = xres_ref[0, 0, pl.ds(0, ho), pl.ds(0, wo), :]
        xs = xs.astype(jnp.bfloat16).reshape(ho * wo, cin)
        res = jnp.dot(xs, wsc_ref[...], preferred_element_type=jnp.float32)
        res = res * scale_sc_ref[...] + bias_sc_ref[...]
    else:
        # identity shortcut: un-padded x lives at offset (1, 1) of phase 0.
        res = xres_ref[0, 0, pl.ds(1, ho), pl.ds(1, wo), :]
        res = res.reshape(ho * wo, tn).astype(jnp.float32)

    o_ref[...] = jnp.maximum(y + res, 0.0).reshape(1, ho, wo, tn).astype(o_ref.dtype)


# --------------------------- pallas_call wrappers --------------------------- #

def _compiler_params():
    return pltpu.CompilerParams(
        dimension_semantics=("parallel", "parallel"),
        vmem_limit_bytes=_VMEM_LIMIT)


def _conv1_call(xpp, w, scale, bias, *, stride, h_out, w_out):
    n, ss, hps, wps, cin = xpp.shape
    cout = w.shape[-1]
    tn = min(LANE, cout)
    hop, wop = h_out + 2, w_out + 2
    flops = 2 * n * h_out * w_out * 9 * cin * cout
    bytes_accessed = int(xpp.size * 4 + w.size * 2
                         + (scale.size + bias.size) * 4
                         + n * hop * wop * cout * 4)
    return pl.pallas_call(
        functools.partial(_conv1_kernel, stride=stride),
        out_shape=jax.ShapeDtypeStruct((n, hop, wop, cout), jnp.float32),
        grid_spec=pltpu.PrefetchScalarGridSpec(
            num_scalar_prefetch=0,
            grid=(n, cout // tn),
            in_specs=[
                pl.BlockSpec((1, ss, hps, wps, cin), lambda i, j: (i, 0, 0, 0, 0)),
                pl.BlockSpec((9, cin, tn), lambda i, j: (0, 0, j)),
                pl.BlockSpec((1, tn), lambda i, j: (0, j)),
                pl.BlockSpec((1, tn), lambda i, j: (0, j)),
            ],
            out_specs=pl.BlockSpec((1, hop, wop, tn), lambda i, j: (i, 0, 0, j)),
        ),
        compiler_params=_compiler_params(),
        cost_estimate=pl.CostEstimate(flops=flops, transcendentals=0,
                                      bytes_accessed=bytes_accessed),
    )(xpp, w, scale, bias)


def _conv2_call(y1p, w2, scale2, bias2, xpp, wsc, scale_sc, bias_sc,
                *, shortcut_conv):
    n, hop, wop, cmid = y1p.shape
    ho, wo = hop - 2, wop - 2
    cout = w2.shape[-1]
    tn = min(LANE, cout)
    _, ss, hps, wps, cin = xpp.shape
    res_phase = ss - 1 if shortcut_conv else 0   # phase (s-1, s-1) holds x[::s, ::s]

    in_specs = [
        pl.BlockSpec((1, hop, wop, cmid), lambda i, j: (i, 0, 0, 0)),
        pl.BlockSpec((9, cmid, tn), lambda i, j: (0, 0, j)),
        pl.BlockSpec((1, tn), lambda i, j: (0, j)),
        pl.BlockSpec((1, tn), lambda i, j: (0, j)),
    ]
    args = [y1p, w2, scale2, bias2]
    if shortcut_conv:
        in_specs += [
            pl.BlockSpec((1, 1, hps, wps, cin),
                         lambda i, j: (i, res_phase, 0, 0, 0)),
            pl.BlockSpec((cin, tn), lambda i, j: (0, j)),
            pl.BlockSpec((1, tn), lambda i, j: (0, j)),
            pl.BlockSpec((1, tn), lambda i, j: (0, j)),
        ]
        args += [xpp, wsc, scale_sc, bias_sc]
    else:
        in_specs.append(
            pl.BlockSpec((1, 1, hps, wps, tn), lambda i, j: (i, 0, 0, 0, j)))
        args.append(xpp)

    flops = 2 * n * ho * wo * (9 * cmid + (cin if shortcut_conv else 0)) * cout
    bytes_accessed = int(sum(a.size * a.dtype.itemsize for a in args)
                         + n * ho * wo * cout * 4)
    return pl.pallas_call(
        functools.partial(_conv2_kernel, shortcut_conv=shortcut_conv),
        out_shape=jax.ShapeDtypeStruct((n, ho, wo, cout), jnp.float32),
        grid_spec=pltpu.PrefetchScalarGridSpec(
            num_scalar_prefetch=0,
            grid=(n, cout // tn),
            in_specs=in_specs,
            out_specs=pl.BlockSpec((1, ho, wo, tn), lambda i, j: (i, 0, 0, j)),
        ),
        compiler_params=_compiler_params(),
        cost_estimate=pl.CostEstimate(flops=flops, transcendentals=0,
                                      bytes_accessed=bytes_accessed),
    )(*args)


# ------------------------------- JAX glue ---------------------------------- #

@functools.partial(jax.jit, static_argnums=(2, 3))
def res_block_forward(x_nchw, params, in_channels, out_channels):
    stride = 2 if in_channels != out_channels else 1
    cin_p = _round_up(in_channels, LANE)
    cout_p = _round_up(out_channels, LANE)
    del cout_p  # (encoded in the param shapes)

    x = jnp.transpose(x_nchw, (0, 2, 3, 1)).astype(jnp.float32)      # NHWC
    n, h, w, _ = x.shape
    ho = (h + 2 - 3) // stride + 1
    wo = (w + 2 - 3) // stride + 1

    # Lane-pad channels, spatial pad=1, then split into stride phases so every
    # in-kernel load (3x3 taps and the 1x1-stride-2 shortcut) is unit-stride.
    xq = _pad_last(x, cin_p)
    hp = _round_up(h + 2, stride)
    wp = _round_up(w + 2, stride)
    xp = jnp.pad(xq, ((0, 0), (1, hp - h - 1), (1, wp - w - 1), (0, 0)))
    xpp = xp.reshape(n, hp // stride, stride, wp // stride, stride, cin_p)
    xpp = jnp.transpose(xpp, (0, 2, 4, 1, 3, 5))
    xpp = xpp.reshape(n, stride * stride, hp // stride, wp // stride, cin_p)

    # blocks[0]+[1]: conv3x3(stride) + BN + ReLU (output carries a fused 1-px pad)
    y1p = _conv1_call(xpp, params["w1"], params["scale1"], params["bias1"],
                      stride=stride, h_out=ho, w_out=wo)

    # blocks[2]: conv3x3(1) + BN, fused with the shortcut (1x1-stride-2 conv+BN
    # or identity), residual add and the final ReLU.
    out = _conv2_call(y1p, params["w2"], params["scale2"], params["bias2"],
                      xpp, params["wsc"], params["scale_sc"], params["bias_sc"],
                      shortcut_conv=(in_channels != out_channels))

    out = out[..., :out_channels]
    return jnp.transpose(out, (0, 3, 1, 2))                          # back to NCHW


# ------------------------------ parameters ---------------------------------- #

# TODO(synk): BatchNorm uses folded running statistics (inference semantics);
# training-mode batch-statistic updates are not implemented.
def _fold_bn(gamma, beta, mean, var, eps=1e-5):
    scale = gamma / jnp.sqrt(var + eps)
    bias = beta - mean * scale
    return scale, bias


def init_params(key, in_channels, out_channels):
    cin_p = _round_up(in_channels, LANE)
    cout_p = _round_up(out_channels, LANE)
    ks = jax.random.split(key, 6)

    def bn_params(k, c):
        k0, k1, k2, k3 = jax.random.split(k, 4)
        gamma = 1.0 + 0.1 * jax.random.normal(k0, (c,), jnp.float32)
        beta = 0.1 * jax.random.normal(k1, (c,), jnp.float32)
        mean = 0.1 * jax.random.normal(k2, (c,), jnp.float32)
        var = jax.random.uniform(k3, (c,), jnp.float32, minval=0.5, maxval=1.5)
        s, b = _fold_bn(gamma, beta, mean, var)
        sp = jnp.zeros((1, cout_p), jnp.float32).at[0, :c].set(s)
        bp = jnp.zeros((1, cout_p), jnp.float32).at[0, :c].set(b)
        return sp, bp

    def pad_w(wt, ci_p, co_p):
        kh, kw, ci, co = wt.shape
        wpad = jnp.zeros((kh, kw, ci_p, co_p), jnp.float32)
        wpad = wpad.at[:, :, :ci, :co].set(wt)
        return wpad.astype(jnp.bfloat16)

    w1 = 0.2 * jax.random.normal(ks[0], (3, 3, in_channels, out_channels), jnp.float32)
    w2 = 0.2 * jax.random.normal(ks[1], (3, 3, out_channels, out_channels), jnp.float32)
    wsc = 0.2 * jax.random.normal(ks[2], (1, 1, in_channels, out_channels), jnp.float32)

    scale1, bias1 = bn_params(ks[3], out_channels)
    scale2, bias2 = bn_params(ks[4], out_channels)
    scale_sc, bias_sc = bn_params(ks[5], out_channels)

    return dict(
        w1=pad_w(w1, cin_p, cout_p).reshape(9, cin_p, cout_p),
        w2=pad_w(w2, cout_p, cout_p).reshape(9, cout_p, cout_p),
        wsc=pad_w(wsc, cin_p, cout_p).reshape(cin_p, cout_p),
        scale1=scale1, bias1=bias1,
        scale2=scale2, bias2=bias2,
        scale_sc=scale_sc, bias_sc=bias_sc,
    )


# ---------------------------- pure-JAX reference ---------------------------- #

def _ref_conv(x, w, stride, pad):
    return lax.conv_general_dilated(
        x, w.astype(jnp.float32),
        window_strides=(stride, stride),
        padding=((pad, pad), (pad, pad)),
        dimension_numbers=("NHWC", "HWIO", "NHWC"),
        precision=lax.Precision.HIGHEST)


def res_block_reference(x_nchw, params, in_channels, out_channels):
    stride = 2 if in_channels != out_channels else 1
    cin_p = _round_up(in_channels, LANE)
    cout_p = _round_up(out_channels, LANE)

    x = jnp.transpose(x_nchw, (0, 2, 3, 1)).astype(jnp.float32)
    xq = _pad_last(x, cin_p)
    xb = xq.astype(jnp.bfloat16).astype(jnp.float32)      # mirror in-kernel bf16 cast

    w1 = params["w1"].reshape(3, 3, cin_p, cout_p)
    y1 = _ref_conv(xb, w1, stride, 1) * params["scale1"] + params["bias1"]
    y1 = jnp.maximum(y1, 0.0)
    y1b = y1.astype(jnp.bfloat16).astype(jnp.float32)     # mirror bf16 dot operands

    w2 = params["w2"].reshape(3, 3, cout_p, cout_p)
    y2 = _ref_conv(y1b, w2, 1, 1) * params["scale2"] + params["bias2"]

    if in_channels != out_channels:
        wsc = params["wsc"].reshape(1, 1, cin_p, cout_p)
        res = _ref_conv(xb, wsc, 2, 0) * params["scale_sc"] + params["bias_sc"]
    else:
        res = xq

    out = jnp.maximum(y2 + res, 0.0)[..., :out_channels]
    return jnp.transpose(out, (0, 3, 1, 2))


# ---------------------------------- main ------------------------------------ #

if __name__ == "__main__":
    N, Cin, Cout, H, W = 2, 4, 8, 16, 16
    key = jax.random.PRNGKey(0)
    kx, kp = jax.random.split(key)

    x = jax.random.normal(kx, (N, Cin, H, W), dtype=jnp.float32)
    params = init_params(kp, Cin, Cout)

    out = res_block_forward(x, params, Cin, Cout)
    out = jax.block_until_ready(out)
    assert out.shape == (N, Cout, H // 2, W // 2), out.shape

    ref = res_block_reference(x, params, Cin, Cout)
    err = float(jnp.max(jnp.abs(out - ref)))
    if err > 1e-2:
        raise AssertionError(f"Pallas output mismatch vs reference, max abs err = {err}")

    print("KERNEL_OK")
</pallas_src>

<mosaic_0001>
module attributes {stable_mosaic.version = 11 : i64} {
  func.func @_conv1_kernel(%arg0: i32, %arg1: i32, %arg2: memref<1x4x9x9x128xf32, #tpu.memory_space<vmem>>, %arg3: memref<9x128x128xbf16, #tpu.memory_space<vmem>>, %arg4: memref<1x128xf32, #tpu.memory_space<vmem>>, %arg5: memref<1x128xf32, #tpu.memory_space<vmem>>, %arg6: memref<1x10x10x128xf32, #tpu.memory_space<vmem>>) attributes {dimension_semantics = [#tpu.dimension_semantics<parallel>, #tpu.dimension_semantics<parallel>], iteration_bounds = array<i64: 2, 1>, scalar_prefetch = 0 : i64, scratch_operands = 0 : i64, tpu.core_type = #tpu.core_type<tc>, window_params = [{transform_indices = @transform_0, window_bounds = array<i64: 1, 4, 9, 9, 128>}, {transform_indices = @transform_1, window_bounds = array<i64: 9, 128, 128>}, {transform_indices = @transform_2, window_bounds = array<i64: 1, 128>}, {transform_indices = @transform_3, window_bounds = array<i64: 1, 128>}, {transform_indices = @transform_4, window_bounds = array<i64: 1, 10, 10, 128>}]} {
    %cst = arith.constant 0.000000e+00 : f32
    %0 = vector.broadcast %cst : f32 to vector<64x128xf32>
    %c0 = arith.constant 0 : index
    %c0_0 = arith.constant 0 : index
    %c0_1 = arith.constant 0 : index
    %c0_2 = arith.constant 0 : index
    %c0_3 = arith.constant 0 : index
    %1 = vector.load %arg2[%c0, %c0_0, %c0_1, %c0_2, %c0_3] : memref<1x4x9x9x128xf32, #tpu.memory_space<vmem>>, vector<1x1x8x8x128xf32>
    %2 = vector.shape_cast %1 : vector<1x1x8x8x128xf32> to vector<8x8x128xf32>
    %3 = arith.truncf %2 : vector<8x8x128xf32> to vector<8x8x128xbf16>
    %4 = vector.shape_cast %3 : vector<8x8x128xbf16> to vector<64x128xbf16>
    %c0_4 = arith.constant 0 : index
    %c0_5 = arith.constant 0 : index
    %c0_6 = arith.constant 0 : index
    %5 = vector.load %arg3[%c0_4, %c0_5, %c0_6] : memref<9x128x128xbf16, #tpu.memory_space<vmem>>, vector<1x128x128xbf16>
    %6 = vector.shape_cast %5 : vector<1x128x128xbf16> to vector<128x128xbf16>
    %cst_7 = arith.constant dense<0.000000e+00> : vector<64x128xf32>
    %7 = tpu.matmul %4, %6, %cst_7 {dimension_numbers = #tpu.dot_dimension_numbers<[1], [0], [0], [1], [0, 0, 1, 1], [], []>} : vector<64x128xbf16>, vector<128x128xbf16>, vector<64x128xf32> -> vector<64x128xf32>
    %8 = arith.addf %0, %7 : vector<64x128xf32>
    %c0_8 = arith.constant 0 : index
    %c1 = arith.constant 1 : index
    %c0_9 = arith.constant 0 : index
    %c0_10 = arith.constant 0 : index
    %c0_11 = arith.constant 0 : index
    %9 = vector.load %arg2[%c0_8, %c1, %c0_9, %c0_10, %c0_11] : memref<1x4x9x9x128xf32, #tpu.memory_space<vmem>>, vector<1x1x8x8x128xf32>
    %10 = vector.shape_cast %9 : vector<1x1x8x8x128xf32> to vector<8x8x128xf32>
    %11 = arith.truncf %10 : vector<8x8x128xf32> to vector<8x8x128xbf16>
    %12 = vector.shape_cast %11 : vector<8x8x128xbf16> to vector<64x128xbf16>
    %c1_12 = arith.constant 1 : index
    %c0_13 = arith.constant 0 : index
    %c0_14 = arith.constant 0 : index
    %13 = vector.load %arg3[%c1_12, %c0_13, %c0_14] : memref<9x128x128xbf16, #tpu.memory_space<vmem>>, vector<1x128x128xbf16>
    %14 = vector.shape_cast %13 : vector<1x128x128xbf16> to vector<128x128xbf16>
    %cst_15 = arith.constant dense<0.000000e+00> : vector<64x128xf32>
    %15 = tpu.matmul %12, %14, %cst_15 {dimension_numbers = #tpu.dot_dimension_numbers<[1], [0], [0], [1], [0, 0, 1, 1], [], []>} : vector<64x128xbf16>, vector<128x128xbf16>, vector<64x128xf32> -> vector<64x128xf32>
    %16 = arith.addf %8, %15 : vector<64x128xf32>
    %c0_16 = arith.constant 0 : index
    %c0_17 = arith.constant 0 : index
    %c0_18 = arith.constant 0 : index
    %c1_19 = arith.constant 1 : index
    %c0_20 = arith.constant 0 : index
    %17 = vector.load %arg2[%c0_16, %c0_17, %c0_18, %c1_19, %c0_20] : memref<1x4x9x9x128xf32, #tpu.memory_space<vmem>>, vector<1x1x8x8x128xf32>
    %18 = vector.shape_cast %17 : vector<1x1x8x8x128xf32> to vector<8x8x128xf32>
    %19 = arith.truncf %18 : vector<8x8x128xf32> to vector<8x8x128xbf16>
    %20 = vector.shape_cast %19 : vector<8x8x128xbf16> to vector<64x128xbf16>
    %c2 = arith.constant 2 : index
    %c0_21 = arith.constant 0 : index
    %c0_22 = arith.constant 0 : index
    %21 = vector.load %arg3[%c2, %c0_21, %c0_22] : memref<9x128x128xbf16, #tpu.memory_space<vmem>>, vector<1x128x128xbf16>
    %22 = vector.shape_cast %21 : vector<1x128x128xbf16> to vector<128x128xbf16>
    %cst_23 = arith.constant dense<0.000000e+00> : vector<64x128xf32>
    %23 = tpu.matmul %20, %22, %cst_23 {dimension_numbers = #tpu.dot_dimension_numbers<[1], [0], [0], [1], [0, 0, 1, 1], [], []>} : vector<64x128xbf16>, vector<128x128xbf16>, vector<64x128xf32> -> vector<64x128xf32>
    %24 = arith.addf %16, %23 : vector<64x128xf32>
    %c0_24 = arith.constant 0 : index
    %c2_25 = arith.constant 2 : index
    %c0_26 = arith.constant 0 : index
    %c0_27 = arith.constant 0 : index
    %c0_28 = arith.constant 0 : index
    %25 = vector.load %arg2[%c0_24, %c2_25, %c0_26, %c0_27, %c0_28] : memref<1x4x9x9x128xf32, #tpu.memory_space<vmem>>, vector<1x1x8x8x128xf32>
    %26 = vector.shape_cast %25 : vector<1x1x8x8x128xf32> to vector<8x8x128xf32>
    %27 = arith.truncf %26 : vector<8x8x128xf32> to vector<8x8x128xbf16>
    %28 = vector.shape_cast %27 : vector<8x8x128xbf16> to vector<64x128xbf16>
    %c3 = arith.constant 3 : index
    %c0_29 = arith.constant 0 : index
    %c0_30 = arith.constant 0 : index
    %29 = vector.load %arg3[%c3, %c0_29, %c0_30] : memref<9x128x128xbf16, #tpu.memory_space<vmem>>, vector<1x128x128xbf16>
    %30 = vector.shape_cast %29 : vector<1x128x128xbf16> to vector<128x128xbf16>
    %cst_31 = arith.constant dense<0.000000e+00> : vector<64x128xf32>
    %31 = tpu.matmul %28, %30, %cst_31 {dimension_numbers = #tpu.dot_dimension_numbers<[1], [0], [0], [1], [0, 0, 1, 1], [], []>} : vector<64x128xbf16>, vector<128x128xbf16>, vector<64x128xf32> -> vector<64x128xf32>
    %32 = arith.addf %24, %31 : vector<64x128xf32>
    %c0_32 = arith.constant 0 : index
    %c3_33 = arith.constant 3 : index
    %c0_34 = arith.constant 0 : index
    %c0_35 = arith.constant 0 : index
    %c0_36 = arith.constant 0 : index
    %33 = vector.load %arg2[%c0_32, %c3_33, %c0_34, %c0_35, %c0_36] : memref<1x4x9x9x128xf32, #tpu.memory_space<vmem>>, vector<1x1x8x8x128xf32>
    %34 = vector.shape_cast %33 : vector<1x1x8x8x128xf32> to vector<8x8x128xf32>
    %35 = arith.truncf %34 : vector<8x8x128xf32> to vector<8x8x128xbf16>
    %36 = vector.shape_cast %35 : vector<8x8x128xbf16> to vector<64x128xbf16>
    %c4 = arith.constant 4 : index
    %c0_37 = arith.constant 0 : index
    %c0_38 = arith.constant 0 : index
    %37 = vector.load %arg3[%c4, %c0_37, %c0_38] : memref<9x128x128xbf16, #tpu.memory_space<vmem>>, vector<1x128x128xbf16>
    %38 = vector.shape_cast %37 : vector<1x128x128xbf16> to vector<128x128xbf16>
    %cst_39 = arith.constant dense<0.000000e+00> : vector<64x128xf32>
    %39 = tpu.matmul %36, %38, %cst_39 {dimension_numbers = #tpu.dot_dimension_numbers<[1], [0], [0], [1], [0, 0, 1, 1], [], []>} : vector<64x128xbf16>, vector<128x128xbf16>, vector<64x128xf32> -> vector<64x128xf32>
    %40 = arith.addf %32, %39 : vector<64x128xf32>
    %c0_40 = arith.constant 0 : index
    %c2_41 = arith.constant 2 : index
    %c0_42 = arith.constant 0 : index
    %c1_43 = arith.constant 1 : index
    %c0_44 = arith.constant 0 : index
    %41 = vector.load %arg2[%c0_40, %c2_41, %c0_42, %c1_43, %c0_44] : memref<1x4x9x9x128xf32, #tpu.memory_space<vmem>>, vector<1x1x8x8x128xf32>
    %42 = vector.shape_cast %41 : vector<1x1x8x8x128xf32> to vector<8x8x128xf32>
    %43 = arith.truncf %42 : vector<8x8x128xf32> to vector<8x8x128xbf16>
    %44 = vector.shape_cast %43 : vector<8x8x128xbf16> to vector<64x128xbf16>
    %c5 = arith.constant 5 : index
    %c0_45 = arith.constant 0 : index
    %c0_46 = arith.constant 0 : index
    %45 = vector.load %arg3[%c5, %c0_45, %c0_46] : memref<9x128x128xbf16, #tpu.memory_space<vmem>>, vector<1x128x128xbf16>
    %46 = vector.shape_cast %45 : vector<1x128x128xbf16> to vector<128x128xbf16>
    %cst_47 = arith.constant dense<0.000000e+00> : vector<64x128xf32>
    %47 = tpu.matmul %44, %46, %cst_47 {dimension_numbers = #tpu.dot_dimension_numbers<[1], [0], [0], [1], [0, 0, 1, 1], [], []>} : vector<64x128xbf16>, vector<128x128xbf16>, vector<64x128xf32> -> vector<64x128xf32>
    %48 = arith.addf %40, %47 : vector<64x128xf32>
    %c0_48 = arith.constant 0 : index
    %c0_49 = arith.constant 0 : index
    %c1_50 = arith.constant 1 : index
    %c0_51 = arith.constant 0 : index
    %c0_52 = arith.constant 0 : index
    %49 = vector.load %arg2[%c0_48, %c0_49, %c1_50, %c0_51, %c0_52] : memref<1x4x9x9x128xf32, #tpu.memory_space<vmem>>, vector<1x1x8x8x128xf32>
    %50 = vector.shape_cast %49 : vector<1x1x8x8x128xf32> to vector<8x8x128xf32>
    %51 = arith.truncf %50 : vector<8x8x128xf32> to vector<8x8x128xbf16>
    %52 = vector.shape_cast %51 : vector<8x8x128xbf16> to vector<64x128xbf16>
    %c6 = arith.constant 6 : index
    %c0_53 = arith.constant 0 : index
    %c0_54 = arith.constant 0 : index
    %53 = vector.load %arg3[%c6, %c0_53, %c0_54] : memref<9x128x128xbf16, #tpu.memory_space<vmem>>, vector<1x128x128xbf16>
    %54 = vector.shape_cast %53 : vector<1x128x128xbf16> to vector<128x128xbf16>
    %cst_55 = arith.constant dense<0.000000e+00> : vector<64x128xf32>
    %55 = tpu.matmul %52, %54, %cst_55 {dimension_numbers = #tpu.dot_dimension_numbers<[1], [0], [0], [1], [0, 0, 1, 1], [], []>} : vector<64x128xbf16>, vector<128x128xbf16>, vector<64x128xf32> -> vector<64x128xf32>
    %56 = arith.addf %48, %55 : vector<64x128xf32>
    %c0_56 = arith.constant 0 : index
    %c1_57 = arith.constant 1 : index
    %c1_58 = arith.constant 1 : index
    %c0_59 = arith.constant 0 : index
    %c0_60 = arith.constant 0 : index
    %57 = vector.load %arg2[%c0_56, %c1_57, %c1_58, %c0_59, %c0_60] : memref<1x4x9x9x128xf32, #tpu.memory_space<vmem>>, vector<1x1x8x8x128xf32>
    %58 = vector.shape_cast %57 : vector<1x1x8x8x128xf32> to vector<8x8x128xf32>
    %59 = arith.truncf %58 : vector<8x8x128xf32> to vector<8x8x128xbf16>
    %60 = vector.shape_cast %59 : vector<8x8x128xbf16> to vector<64x128xbf16>
    %c7 = arith.constant 7 : index
    %c0_61 = arith.constant 0 : index
    %c0_62 = arith.constant 0 : index
    %61 = vector.load %arg3[%c7, %c0_61, %c0_62] : memref<9x128x128xbf16, #tpu.memory_space<vmem>>, vector<1x128x128xbf16>
    %62 = vector.shape_cast %61 : vector<1x128x128xbf16> to vector<128x128xbf16>
    %cst_63 = arith.constant dense<0.000000e+00> : vector<64x128xf32>
    %63 = tpu.matmul %60, %62, %cst_63 {dimension_numbers = #tpu.dot_dimension_numbers<[1], [0], [0], [1], [0, 0, 1, 1], [], []>} : vector<64x128xbf16>, vector<128x128xbf16>, vector<64x128xf32> -> vector<64x128xf32>
    %64 = arith.addf %56, %63 : vector<64x128xf32>
    %c0_64 = arith.constant 0 : index
    %c0_65 = arith.constant 0 : index
    %c1_66 = arith.constant 1 : index
    %c1_67 = arith.constant 1 : index
    %c0_68 = arith.constant 0 : index
    %65 = vector.load %arg2[%c0_64, %c0_65, %c1_66, %c1_67, %c0_68] : memref<1x4x9x9x128xf32, #tpu.memory_space<vmem>>, vector<1x1x8x8x128xf32>
    %66 = vector.shape_cast %65 : vector<1x1x8x8x128xf32> to vector<8x8x128xf32>
    %67 = arith.truncf %66 : vector<8x8x128xf32> to vector<8x8x128xbf16>
    %68 = vector.shape_cast %67 : vector<8x8x128xbf16> to vector<64x128xbf16>
    %c8 = arith.constant 8 : index
    %c0_69 = arith.constant 0 : index
    %c0_70 = arith.constant 0 : index
    %69 = vector.load %arg3[%c8, %c0_69, %c0_70] : memref<9x128x128xbf16, #tpu.memory_space<vmem>>, vector<1x128x128xbf16>
    %70 = vector.shape_cast %69 : vector<1x128x128xbf16> to vector<128x128xbf16>
    %cst_71 = arith.constant dense<0.000000e+00> : vector<64x128xf32>
    %71 = tpu.matmul %68, %70, %cst_71 {dimension_numbers = #tpu.dot_dimension_numbers<[1], [0], [0], [1], [0, 0, 1, 1], [], []>} : vector<64x128xbf16>, vector<128x128xbf16>, vector<64x128xf32> -> vector<64x128xf32>
    %72 = arith.addf %64, %71 : vector<64x128xf32>
    %c0_72 = arith.constant 0 : index
    %c0_73 = arith.constant 0 : index
    %73 = vector.load %arg4[%c0_72, %c0_73] : memref<1x128xf32, #tpu.memory_space<vmem>>, vector<1x128xf32>
    %74 = vector.broadcast %73 : vector<1x128xf32> to vector<64x128xf32>
    %75 = arith.mulf %72, %74 : vector<64x128xf32>
    %c0_74 = arith.constant 0 : index
    %c0_75 = arith.constant 0 : index
    %76 = vector.load %arg5[%c0_74, %c0_75] : memref<1x128xf32, #tpu.memory_space<vmem>>, vector<1x128xf32>
    %77 = vector.broadcast %76 : vector<1x128xf32> to vector<64x128xf32>
    %78 = arith.addf %75, %77 : vector<64x128xf32>
    %cst_76 = arith.constant 0.000000e+00 : f32
    %79 = vector.broadcast %cst_76 : f32 to vector<64x128xf32>
    %80 = arith.maximumf %78, %79 : vector<64x128xf32>
    %cst_77 = arith.constant 0.000000e+00 : f32
    %81 = vector.broadcast %cst_77 : f32 to vector<1x10x10x128xf32>
    %c0_78 = arith.constant 0 : index
    %c0_79 = arith.constant 0 : index
    %c0_80 = arith.constant 0 : index
    %c0_81 = arith.constant 0 : index
    %82 = vector.load %arg6[%c0_78, %c0_79, %c0_80, %c0_81] : memref<1x10x10x128xf32, #tpu.memory_space<vmem>>, vector<1x10x10x128xf32>
    tpu.vector_store %arg6[%c0_78, %c0_79, %c0_80, %c0_81], %81 {strides = array<i32>} : memref<1x10x10x128xf32, #tpu.memory_space<vmem>>, vector<1x10x10x128xf32>,
    %83 = vector.shape_cast %80 : vector<64x128xf32> to vector<8x8x128xf32>
    %c0_82 = arith.constant 0 : index
    %c1_83 = arith.constant 1 : index
    %c1_84 = arith.constant 1 : index
    %c0_85 = arith.constant 0 : index
    %84 = vector.load %arg6[%c0_82, %c1_83, %c1_84, %c0_85] : memref<1x10x10x128xf32, #tpu.memory_space<vmem>>, vector<1x8x8x128xf32>
    %85 = vector.shape_cast %84 : vector<1x8x8x128xf32> to vector<8x8x128xf32>
    %86 = vector.shape_cast %83 : vector<8x8x128xf32> to vector<1x8x8x128xf32>
    tpu.vector_store %arg6[%c0_82, %c1_83, %c1_84, %c0_85], %86 {strides = array<i32>} : memref<1x10x10x128xf32, #tpu.memory_space<vmem>>, vector<1x8x8x128xf32>,
    return
  }
  func.func @transform_0(%arg0: i32, %arg1: i32) -> (i32, i32, i32, i32, i32) {
    %c0_i32 = arith.constant 0 : i32
    %c0_i32_0 = arith.constant 0 : i32
    %c0_i32_1 = arith.constant 0 : i32
    %c0_i32_2 = arith.constant 0 : i32
    %c0_i32_3 = arith.constant 0 : i32
    return %arg0, %c0_i32, %c0_i32_0, %c0_i32_1, %c0_i32_2 : i32, i32, i32, i32, i32
  }
  func.func @transform_1(%arg0: i32, %arg1: i32) -> (i32, i32, i32) {
    %c0_i32 = arith.constant 0 : i32
    %c0_i32_0 = arith.constant 0 : i32
    %c0_i32_1 = arith.constant 0 : i32
    return %c0_i32, %c0_i32_0, %arg1 : i32, i32, i32
  }
  func.func @transform_2(%arg0: i32, %arg1: i32) -> (i32, i32) {
    %c0_i32 = arith.constant 0 : i32
    %c0_i32_0 = arith.constant 0 : i32
    return %c0_i32, %arg1 : i32, i32
  }
  func.func @transform_3(%arg0: i32, %arg1: i32) -> (i32, i32) {
    %c0_i32 = arith.constant 0 : i32
    %c0_i32_0 = arith.constant 0 : i32
    return %c0_i32, %arg1 : i32, i32
  }
  func.func @transform_4(%arg0: i32, %arg1: i32) -> (i32, i32, i32, i32) {
    %c0_i32 = arith.constant 0 : i32
    %c0_i32_0 = arith.constant 0 : i32
    %c0_i32_1 = arith.constant 0 : i32
    return %arg0, %c0_i32, %c0_i32_0, %arg1 : i32, i32, i32, i32
  }
}

module attributes {stable_mosaic.version = 11 : i64} {
  func.func @_conv2_kernel(%arg0: i32, %arg1: i32, %arg2: memref<1x10x10x128xf32, #tpu.memory_space<vmem>>, %arg3: memref<9x128x128xbf16, #tpu.memory_space<vmem>>, %arg4: memref<1x128xf32, #tpu.memory_space<vmem>>, %arg5: memref<1x128xf32, #tpu.memory_space<vmem>>, %arg6: memref<1x1x9x9x128xf32, #tpu.memory_space<vmem>>, %arg7: memref<128x128xbf16, #tpu.memory_space<vmem>>, %arg8: memref<1x128xf32, #tpu.memory_space<vmem>>, %arg9: memref<1x128xf32, #tpu.memory_space<vmem>>, %arg10: memref<1x8x8x128xf32, #tpu.memory_space<vmem>>) attributes {dimension_semantics = [#tpu.dimension_semantics<parallel>, #tpu.dimension_semantics<parallel>], iteration_bounds = array<i64: 2, 1>, scalar_prefetch = 0 : i64, scratch_operands = 0 : i64, tpu.core_type = #tpu.core_type<tc>, window_params = [{transform_indices = @transform_0, window_bounds = array<i64: 1, 10, 10, 128>}, {transform_indices = @transform_1, window_bounds = array<i64: 9, 128, 128>}, {transform_indices = @transform_2, window_bounds = array<i64: 1, 128>}, {transform_indices = @transform_3, window_bounds = array<i64: 1, 128>}, {transform_indices = @transform_4, window_bounds = array<i64: 1, 1, 9, 9, 128>}, {transform_indices = @transform_5, window_bounds = array<i64: 128, 128>}, {transform_indices = @transform_6, window_bounds = array<i64: 1, 128>}, {transform_indices = @transform_7, window_bounds = array<i64: 1, 128>}, {transform_indices = @transform_8, window_bounds = array<i64: 1, 8, 8, 128>}]} {
    %cst = arith.constant 0.000000e+00 : f32
    %0 = vector.broadcast %cst : f32 to vector<64x128xf32>
    %c0 = arith.constant 0 : index
    %c0_0 = arith.constant 0 : index
    %c0_1 = arith.constant 0 : index
    %c0_2 = arith.constant 0 : index
    %1 = vector.load %arg2[%c0, %c0_0, %c0_1, %c0_2] : memref<1x10x10x128xf32, #tpu.memory_space<vmem>>, vector<1x8x8x128xf32>
    %2 = vector.shape_cast %1 : vector<1x8x8x128xf32> to vector<8x8x128xf32>
    %3 = arith.truncf %2 : vector<8x8x128xf32> to vector<8x8x128xbf16>
    %4 = vector.shape_cast %3 : vector<8x8x128xbf16> to vector<64x128xbf16>
    %c0_3 = arith.constant 0 : index
    %c0_4 = arith.constant 0 : index
    %c0_5 = arith.constant 0 : index
    %5 = vector.load %arg3[%c0_3, %c0_4, %c0_5] : memref<9x128x128xbf16, #tpu.memory_space<vmem>>, vector<1x128x128xbf16>
    %6 = vector.shape_cast %5 : vector<1x128x128xbf16> to vector<128x128xbf16>
    %cst_6 = arith.constant dense<0.000000e+00> : vector<64x128xf32>
    %7 = tpu.matmul %4, %6, %cst_6 {dimension_numbers = #tpu.dot_dimension_numbers<[1], [0], [0], [1], [0, 0, 1, 1], [], []>} : vector<64x128xbf16>, vector<128x128xbf16>, vector<64x128xf32> -> vector<64x128xf32>
    %8 = arith.addf %0, %7 : vector<64x128xf32>
    %c0_7 = arith.constant 0 : index
    %c0_8 = arith.constant 0 : index
    %c1 = arith.constant 1 : index
    %c0_9 = arith.constant 0 : index
    %9 = vector.load %arg2[%c0_7, %c0_8, %c1, %c0_9] : memref<1x10x10x128xf32, #tpu.memory_space<vmem>>, vector<1x8x8x128xf32>
    %10 = vector.shape_cast %9 : vector<1x8x8x128xf32> to vector<8x8x128xf32>
    %11 = arith.truncf %10 : vector<8x8x128xf32> to vector<8x8x128xbf16>
    %12 = vector.shape_cast %11 : vector<8x8x128xbf16> to vector<64x128xbf16>
    %c1_10 = arith.constant 1 : index
    %c0_11 = arith.constant 0 : index
    %c0_12 = arith.constant 0 : index
    %13 = vector.load %arg3[%c1_10, %c0_11, %c0_12] : memref<9x128x128xbf16, #tpu.memory_space<vmem>>, vector<1x128x128xbf16>
    %14 = vector.shape_cast %13 : vector<1x128x128xbf16> to vector<128x128xbf16>
    %cst_13 = arith.constant dense<0.000000e+00> : vector<64x128xf32>
    %15 = tpu.matmul %12, %14, %cst_13 {dimension_numbers = #tpu.dot_dimension_numbers<[1], [0], [0], [1], [0, 0, 1, 1], [], []>} : vector<64x128xbf16>, vector<128x128xbf16>, vector<64x128xf32> -> vector<64x128xf32>
    %16 = arith.addf %8, %15 : vector<64x128xf32>
    %c0_14 = arith.constant 0 : index
    %c0_15 = arith.constant 0 : index
    %c2 = arith.constant 2 : index
    %c0_16 = arith.constant 0 : index
    %17 = vector.load %arg2[%c0_14, %c0_15, %c2, %c0_16] : memref<1x10x10x128xf32, #tpu.memory_space<vmem>>, vector<1x8x8x128xf32>
    %18 = vector.shape_cast %17 : vector<1x8x8x128xf32> to vector<8x8x128xf32>
    %19 = arith.truncf %18 : vector<8x8x128xf32> to vector<8x8x128xbf16>
    %20 = vector.shape_cast %19 : vector<8x8x128xbf16> to vector<64x128xbf16>
    %c2_17 = arith.constant 2 : index
    %c0_18 = arith.constant 0 : index
    %c0_19 = arith.constant 0 : index
    %21 = vector.load %arg3[%c2_17, %c0_18, %c0_19] : memref<9x128x128xbf16, #tpu.memory_space<vmem>>, vector<1x128x128xbf16>
    %22 = vector.shape_cast %21 : vector<1x128x128xbf16> to vector<128x128xbf16>
    %cst_20 = arith.constant dense<0.000000e+00> : vector<64x128xf32>
    %23 = tpu.matmul %20, %22, %cst_20 {dimension_numbers = #tpu.dot_dimension_numbers<[1], [0], [0], [1], [0, 0, 1, 1], [], []>} : vector<64x128xbf16>, vector<128x128xbf16>, vector<64x128xf32> -> vector<64x128xf32>
    %24 = arith.addf %16, %23 : vector<64x128xf32>
    %c0_21 = arith.constant 0 : index
    %c1_22 = arith.constant 1 : index
    %c0_23 = arith.constant 0 : index
    %c0_24 = arith.constant 0 : index
    %25 = vector.load %arg2[%c0_21, %c1_22, %c0_23, %c0_24] : memref<1x10x10x128xf32, #tpu.memory_space<vmem>>, vector<1x8x8x128xf32>
    %26 = vector.shape_cast %25 : vector<1x8x8x128xf32> to vector<8x8x128xf32>
    %27 = arith.truncf %26 : vector<8x8x128xf32> to vector<8x8x128xbf16>
    %28 = vector.shape_cast %27 : vector<8x8x128xbf16> to vector<64x128xbf16>
    %c3 = arith.constant 3 : index
    %c0_25 = arith.constant 0 : index
    %c0_26 = arith.constant 0 : index
    %29 = vector.load %arg3[%c3, %c0_25, %c0_26] : memref<9x128x128xbf16, #tpu.memory_space<vmem>>, vector<1x128x128xbf16>
    %30 = vector.shape_cast %29 : vector<1x128x128xbf16> to vector<128x128xbf16>
    %cst_27 = arith.constant dense<0.000000e+00> : vector<64x128xf32>
    %31 = tpu.matmul %28, %30, %cst_27 {dimension_numbers = #tpu.dot_dimension_numbers<[1], [0], [0], [1], [0, 0, 1, 1], [], []>} : vector<64x128xbf16>, vector<128x128xbf16>, vector<64x128xf32> -> vector<64x128xf32>
    %32 = arith.addf %24, %31 : vector<64x128xf32>
    %c0_28 = arith.constant 0 : index
    %c1_29 = arith.constant 1 : index
    %c1_30 = arith.constant 1 : index
    %c0_31 = arith.constant 0 : index
    %33 = vector.load %arg2[%c0_28, %c1_29, %c1_30, %c0_31] : memref<1x10x10x128xf32, #tpu.memory_space<vmem>>, vector<1x8x8x128xf32>
    %34 = vector.shape_cast %33 : vector<1x8x8x128xf32> to vector<8x8x128xf32>
    %35 = arith.truncf %34 : vector<8x8x128xf32> to vector<8x8x128xbf16>
    %36 = vector.shape_cast %35 : vector<8x8x128xbf16> to vector<64x128xbf16>
    %c4 = arith.constant 4 : index
    %c0_32 = arith.constant 0 : index
    %c0_33 = arith.constant 0 : index
    %37 = vector.load %arg3[%c4, %c0_32, %c0_33] : memref<9x128x128xbf16, #tpu.memory_space<vmem>>, vector<1x128x128xbf16>
    %38 = vector.shape_cast %37 : vector<1x128x128xbf16> to vector<128x128xbf16>
    %cst_34 = arith.constant dense<0.000000e+00> : vector<64x128xf32>
    %39 = tpu.matmul %36, %38, %cst_34 {dimension_numbers = #tpu.dot_dimension_numbers<[1], [0], [0], [1], [0, 0, 1, 1], [], []>} : vector<64x128xbf16>, vector<128x128xbf16>, vector<64x128xf32> -> vector<64x128xf32>
    %40 = arith.addf %32, %39 : vector<64x128xf32>
    %c0_35 = arith.constant 0 : index
    %c1_36 = arith.constant 1 : index
    %c2_37 = arith.constant 2 : index
    %c0_38 = arith.constant 0 : index
    %41 = vector.load %arg2[%c0_35, %c1_36, %c2_37, %c0_38] : memref<1x10x10x128xf32, #tpu.memory_space<vmem>>, vector<1x8x8x128xf32>
    %42 = vector.shape_cast %41 : vector<1x8x8x128xf32> to vector<8x8x128xf32>
    %43 = arith.truncf %42 : vector<8x8x128xf32> to vector<8x8x128xbf16>
    %44 = vector.shape_cast %43 : vector<8x8x128xbf16> to vector<64x128xbf16>
    %c5 = arith.constant 5 : index
    %c0_39 = arith.constant 0 : index
    %c0_40 = arith.constant 0 : index
    %45 = vector.load %arg3[%c5, %c0_39, %c0_40] : memref<9x128x128xbf16, #tpu.memory_space<vmem>>, vector<1x128x128xbf16>
    %46 = vector.shape_cast %45 : vector<1x128x128xbf16> to vector<128x128xbf16>
    %cst_41 = arith.constant dense<0.000000e+00> : vector<64x128xf32>
    %47 = tpu.matmul %44, %46, %cst_41 {dimension_numbers = #tpu.dot_dimension_numbers<[1], [0], [0], [1], [0, 0, 1, 1], [], []>} : vector<64x128xbf16>, vector<128x128xbf16>, vector<64x128xf32> -> vector<64x128xf32>
    %48 = arith.addf %40, %47 : vector<64x128xf32>
    %c0_42 = arith.constant 0 : index
    %c2_43 = arith.constant 2 : index
    %c0_44 = arith.constant 0 : index
    %c0_45 = arith.constant 0 : index
    %49 = vector.load %arg2[%c0_42, %c2_43, %c0_44, %c0_45] : memref<1x10x10x128xf32, #tpu.memory_space<vmem>>, vector<1x8x8x128xf32>
    %50 = vector.shape_cast %49 : vector<1x8x8x128xf32> to vector<8x8x128xf32>
    %51 = arith.truncf %50 : vector<8x8x128xf32> to vector<8x8x128xbf16>
    %52 = vector.shape_cast %51 : vector<8x8x128xbf16> to vector<64x128xbf16>
    %c6 = arith.constant 6 : index
    %c0_46 = arith.constant 0 : index
    %c0_47 = arith.constant 0 : index
    %53 = vector.load %arg3[%c6, %c0_46, %c0_47] : memref<9x128x128xbf16, #tpu.memory_space<vmem>>, vector<1x128x128xbf16>
    %54 = vector.shape_cast %53 : vector<1x128x128xbf16> to vector<128x128xbf16>
    %cst_48 = arith.constant dense<0.000000e+00> : vector<64x128xf32>
    %55 = tpu.matmul %52, %54, %cst_48 {dimension_numbers = #tpu.dot_dimension_numbers<[1], [0], [0], [1], [0, 0, 1, 1], [], []>} : vector<64x128xbf16>, vector<128x128xbf16>, vector<64x128xf32> -> vector<64x128xf32>
    %56 = arith.addf %48, %55 : vector<64x128xf32>
    %c0_49 = arith.constant 0 : index
    %c2_50 = arith.constant 2 : index
    %c1_51 = arith.constant 1 : index
    %c0_52 = arith.constant 0 : index
    %57 = vector.load %arg2[%c0_49, %c2_50, %c1_51, %c0_52] : memref<1x10x10x128xf32, #tpu.memory_space<vmem>>, vector<1x8x8x128xf32>
    %58 = vector.shape_cast %57 : vector<1x8x8x128xf32> to vector<8x8x128xf32>
    %59 = arith.truncf %58 : vector<8x8x128xf32> to vector<8x8x128xbf16>
    %60 = vector.shape_cast %59 : vector<8x8x128xbf16> to vector<64x128xbf16>
    %c7 = arith.constant 7 : index
    %c0_53 = arith.constant 0 : index
    %c0_54 = arith.constant 0 : index
    %61 = vector.load %arg3[%c7, %c0_53, %c0_54] : memref<9x128x128xbf16, #tpu.memory_space<vmem>>, vector<1x128x128xbf16>
    %62 = vector.shape_cast %61 : vector<1x128x128xbf16> to vector<128x128xbf16>
    %cst_55 = arith.constant dense<0.000000e+00> : vector<64x128xf32>
    %63 = tpu.matmul %60, %62, %cst_55 {dimension_numbers = #tpu.dot_dimension_numbers<[1], [0], [0], [1], [0, 0, 1, 1], [], []>} : vector<64x128xbf16>, vector<128x128xbf16>, vector<64x128xf32> -> vector<64x128xf32>
    %64 = arith.addf %56, %63 : vector<64x128xf32>
    %c0_56 = arith.constant 0 : index
    %c2_57 = arith.constant 2 : index
    %c2_58 = arith.constant 2 : index
    %c0_59 = arith.constant 0 : index
    %65 = vector.load %arg2[%c0_56, %c2_57, %c2_58, %c0_59] : memref<1x10x10x128xf32, #tpu.memory_space<vmem>>, vector<1x8x8x128xf32>
    %66 = vector.shape_cast %65 : vector<1x8x8x128xf32> to vector<8x8x128xf32>
    %67 = arith.truncf %66 : vector<8x8x128xf32> to vector<8x8x128xbf16>
    %68 = vector.shape_cast %67 : vector<8x8x128xbf16> to vector<64x128xbf16>
    %c8 = arith.constant 8 : index
    %c0_60 = arith.constant 0 : index
    %c0_61 = arith.constant 0 : index
    %69 = vector.load %arg3[%c8, %c0_60, %c0_61] : memref<9x128x128xbf16, #tpu.memory_space<vmem>>, vector<1x128x128xbf16>
    %70 = vector.shape_cast %69 : vector<1x128x128xbf16> to vector<128x128xbf16>
    %cst_62 = arith.constant dense<0.000000e+00> : vector<64x128xf32>
    %71 = tpu.matmul %68, %70, %cst_62 {dimension_numbers = #tpu.dot_dimension_numbers<[1], [0], [0], [1], [0, 0, 1, 1], [], []>} : vector<64x128xbf16>, vector<128x128xbf16>, vector<64x128xf32> -> vector<64x128xf32>
    %72 = arith.addf %64, %71 : vector<64x128xf32>
    %c0_63 = arith.constant 0 : index
    %c0_64 = arith.constant 0 : index
    %73 = vector.load %arg4[%c0_63, %c0_64] : memref<1x128xf32, #tpu.memory_space<vmem>>, vector<1x128xf32>
    %74 = vector.broadcast %73 : vector<1x128xf32> to vector<64x128xf32>
    %75 = arith.mulf %72, %74 : vector<64x128xf32>
    %c0_65 = arith.constant 0 : index
    %c0_66 = arith.constant 0 : index
    %76 = vector.load %arg5[%c0_65, %c0_66] : memref<1x128xf32, #tpu.memory_space<vmem>>, vector<1x128xf32>
    %77 = vector.broadcast %76 : vector<1x128xf32> to vector<64x128xf32>
    %78 = arith.addf %75, %77 : vector<64x128xf32>
    %c0_67 = arith.constant 0 : index
    %c0_68 = arith.constant 0 : index
    %c0_69 = arith.constant 0 : index
    %c0_70 = arith.constant 0 : index
    %c0_71 = arith.constant 0 : index
    %79 = vector.load %arg6[%c0_67, %c0_68, %c0_69, %c0_70, %c0_71] : memref<1x1x9x9x128xf32, #tpu.memory_space<vmem>>, vector<1x1x8x8x128xf32>
    %80 = vector.shape_cast %79 : vector<1x1x8x8x128xf32> to vector<8x8x128xf32>
    %81 = arith.truncf %80 : vector<8x8x128xf32> to vector<8x8x128xbf16>
    %82 = vector.shape_cast %81 : vector<8x8x128xbf16> to vector<64x128xbf16>
    %c0_72 = arith.constant 0 : index
    %c0_73 = arith.constant 0 : index
    %83 = vector.load %arg7[%c0_72, %c0_73] : memref<128x128xbf16, #tpu.memory_space<vmem>>, vector<128x128xbf16>
    %cst_74 = arith.constant dense<0.000000e+00> : vector<64x128xf32>
    %84 = tpu.matmul %82, %83, %cst_74 {dimension_numbers = #tpu.dot_dimension_numbers<[1], [0], [0], [1], [0, 0, 1, 1], [], []>} : vector<64x128xbf16>, vector<128x128xbf16>, vector<64x128xf32> -> vector<64x128xf32>
    %c0_75 = arith.constant 0 : index
    %c0_76 = arith.constant 0 : index
    %85 = vector.load %arg8[%c0_75, %c0_76] : memref<1x128xf32, #tpu.memory_space<vmem>>, vector<1x128xf32>
    %86 = vector.broadcast %85 : vector<1x128xf32> to vector<64x128xf32>
    %87 = arith.mulf %84, %86 : vector<64x128xf32>
    %c0_77 = arith.constant 0 : index
    %c0_78 = arith.constant 0 : index
    %88 = vector.load %arg9[%c0_77, %c0_78] : memref<1x128xf32, #tpu.memory_space<vmem>>, vector<1x128xf32>
    %89 = vector.broadcast %88 : vector<1x128xf32> to vector<64x128xf32>
    %90 = arith.addf %87, %89 : vector<64x128xf32>
    %91 = arith.addf %78, %90 : vector<64x128xf32>
    %cst_79 = arith.constant 0.000000e+00 : f32
    %92 = vector.broadcast %cst_79 : f32 to vector<64x128xf32>
    %93 = arith.maximumf %91, %92 : vector<64x128xf32>
    %94 = vector.shape_cast %93 : vector<64x128xf32> to vector<1x8x8x128xf32>
    %c0_80 = arith.constant 0 : index
    %c0_81 = arith.constant 0 : index
    %c0_82 = arith.constant 0 : index
    %c0_83 = arith.constant 0 : index
    %95 = vector.load %arg10[%c0_80, %c0_81, %c0_82, %c0_83] : memref<1x8x8x128xf32, #tpu.memory_space<vmem>>, vector<1x8x8x128xf32>
    tpu.vector_store %arg10[%c0_80, %c0_81, %c0_82, %c0_83], %94 {strides = array<i32>} : memref<1x8x8x128xf32, #tpu.memory_space<vmem>>, vector<1x8x8x128xf32>,
    return
  }
  func.func @transform_0(%arg0: i32, %arg1: i32) -> (i32, i32, i32, i32) {
    %c0_i32 = arith.constant 0 : i32
    %c0_i32_0 = arith.constant 0 : i32
    %c0_i32_1 = arith.constant 0 : i32
    %c0_i32_2 = arith.constant 0 : i32
    return %arg0, %c0_i32, %c0_i32_0, %c0_i32_1 : i32, i32, i32, i32
  }
  func.func @transform_1(%arg0: i32, %arg1: i32) -> (i32, i32, i32) {
    %c0_i32 = arith.constant 0 : i32
    %c0_i32_0 = arith.constant 0 : i32
    %c0_i32_1 = arith.constant 0 : i32
    return %c0_i32, %c0_i32_0, %arg1 : i32, i32, i32
  }
  func.func @transform_2(%arg0: i32, %arg1: i32) -> (i32, i32) {
    %c0_i32 = arith.constant 0 : i32
    %c0_i32_0 = arith.constant 0 : i32
    return %c0_i32, %arg1 : i32, i32
  }
  func.func @transform_3(%arg0: i32, %arg1: i32) -> (i32, i32) {
    %c0_i32 = arith.constant 0 : i32
    %c0_i32_0 = arith.constant 0 : i32
    return %c0_i32, %arg1 : i32, i32
  }
  func.func @transform_4(%arg0: i32, %arg1: i32) -> (i32, i32, i32, i32, i32) {
    %c3_i32 = arith.constant 3 : i32
    %c0_i32 = arith.constant 0 : i32
    %c0_i32_0 = arith.constant 0 : i32
    %c0_i32_1 = arith.constant 0 : i32
    %c0_i32_2 = arith.constant 0 : i32
    return %arg0, %c3_i32, %c0_i32, %c0_i32_0, %c0_i32_1 : i32, i32, i32, i32, i32
  }
  func.func @transform_5(%arg0: i32, %arg1: i32) -> (i32, i32) {
    %c0_i32 = arith.constant 0 : i32
    %c0_i32_0 = arith.constant 0 : i32
    return %c0_i32, %arg1 : i32, i32
  }
  func.func @transform_6(%arg0: i32, %arg1: i32) -> (i32, i32) {
    %c0_i32 = arith.constant 0 : i32
    %c0_i32_0 = arith.constant 0 : i32
    return %c0_i32, %arg1 : i32, i32
  }
  func.func @transform_7(%arg0: i32, %arg1: i32) -> (i32, i32) {
    %c0_i32 = arith.constant 0 : i32
    %c0_i32_0 = arith.constant 0 : i32
    return %c0_i32, %arg1 : i32, i32
  }
  func.func @transform_8(%arg0: i32, %arg1: i32) -> (i32, i32, i32, i32) {
    %c0_i32 = arith.constant 0 : i32
    %c0_i32_0 = arith.constant 0 : i32
    %c0_i32_1 = arith.constant 0 : i32
    return %arg0, %c0_i32, %c0_i32_0, %arg1 : i32, i32, i32, i32
  }
}

</mosaic_0001>

<bundles_post_ra>
// kernel: res_block_forward.2
= control target key start
LH: loop header
LB: loop body
LE: loop exit
PB: predicated region body
PF: predicated region fallthrough
CT: control target
= control target key end

     0   :  { %s2877_s15 = smov 0   ;;  %s2879_s16 = smov 0   ;;  %s3342_s0 = inlined_call_operand.vmem [shape: f32[2,4,9,9,128], index: 0, kind: input, shape index: {}]   ;;  %s3343_s1 = inlined_call_operand.vmem [shape: bf16[9,128,128], index: 1, kind: input, shape index: {}]   ;;  %s3344_s2 = inlined_call_operand.vmem [shape: f32[1,128], index: 2, kind: input, shape index: {}]   ;;  %s3345_s3 = inlined_call_operand.vmem [shape: f32[1,128], index: 3, kind: input, shape index: {}]   ;;  %s3346_s4 = inlined_call_operand.vmem [shape: f32[2,10,10,128], index: 4, kind: output, shape index: {}]  }
   0x1   :  { %s2881_s17 = smov 0  }
   0x2 LB: > { %s26_s18 = sadd.s32 1, %s2845_s16  ;;  %p2045_p0 = scmp.ge.s32.totalorder %s2849_s17, 1  ;;  %s2849_s17 = sphi %s2881_s17, %s14_s17   ;;  %s2845_s16 = sphi %s2879_s16, %s3356_s16   ;;  %s2841_s15 = sphi %s2877_s15, %s3355_s15  }
   0x3   : > { %p28_p1 = scmp.ge.s32.totalorder %s26_s18, 2  ;;  %p201_p2 = scmp.lt.s32.totalorder %s2849_s17, 3 }
   0x5   : > { %s3358_s18 = smov (%p28_p1, %s26_s18), 0  ;;  %p202_p3 = pnand %p2045_p0, %p201_p2 }
   0x7   : > { %205 = sbr.rel (%p202_p3) target bundleno = 382 (0x17e), region = 36 }
   0xc   : > { %v2755_v0 = vld [vmem:[%s3343_s1 + $0x78] sm:$0xff]   ;;  %p240_p4 = scmp.lt.s32.totalorder %s2841_s15, 1  ;;  %v2757_v2 = vld [vmem:[%s3343_s1 + $0x70] sm:$0xff]   ;;  %v2759_v4 = vld [vmem:[%s3343_s1 + $0x68] sm:$0xff]  }
   0xd   : > { %v2756_v1 = vld [vmem:[%s3343_s1 + $0x38] sm:$0xff]   ;;  %2496 = vmatprep.subr.bf16.mxu0 %v2755_v0  ;;  %v2758_v3 = vld [vmem:[%s3343_s1 + $0x30] sm:$0xff]   ;;  %v2760_v5 = vld [vmem:[%s3343_s1 + $0x28] sm:$0xff]  }
   0xe   : > { %2520 = vmatprep.subr.bf16.mxu1 %v2756_v1  ;;  %2497 = vmatpush3.bf16.msra.mxu0 %v2755_v0  ;;  %s3360_s15 = smov (!%p240_p4, %s2841_s15), 1  ;;  %v2761_v6 = vld [vmem:[%s3343_s1 + $0x60] sm:$0xff]   ;;  %v2763_v8 = vld [vmem:[%s3343_s1 + $0x58] sm:$0xff]   ;;  %v2765_v10 = vld [vmem:[%s3343_s1 + $0x50] sm:$0xff]  }
   0xf   : > { %2521 = vmatpush3.bf16.msra.mxu1 %v2756_v1  ;;  %2498 = vmatprep.subr.bf16.mxu0 %v2757_v2  ;;  %v2762_v7 = vld [vmem:[%s3343_s1 + $0x20] sm:$0xff]   ;;  %s2728_s9 = smul.u32 576, %s3360_s15  ;;  %v2764_v9 = vld [vmem:[%s3343_s1 + $0x18] sm:$0xff]   ;;  %v2766_v14 = vld [vmem:[%s3343_s1 + $0x10] sm:$0xff]  }
  0x10   : > { %2522 = vmatprep.subr.bf16.mxu1 %v2758_v3  ;;  %v2767_v22 = vld [vmem:[%s3343_s1 + $0x48] sm:$0xff]   ;;  %v2769_v24 = vld [vmem:[%s3343_s1 + $0x40] sm:$0xff]   ;;  %v2771_v28 = vld [vmem:[%s3343_s1 + $0xb8] sm:$0xff]   ;;  %s2729_s14 = smul.u32 160, %s3360_s15 }
  0x11   : > { %s2931_s20 = scalar_lea.vmem %s3342_s0, %s2728_s9  ;;  %v2768_v23 = vld [vmem:[%s3343_s1 + $0x8] sm:$0xff]   ;;  %v2770_v25 = vld [vmem:[%s3343_s1] sm:$0xff]   ;;  %v2772_v30 = vld [vmem:[%s3343_s1 + $0xf8] sm:$0xff]  }
  0x12   : > { %2499 = vmatpush3.bf16.msra.mxu0 %v2757_v2  ;;  %v2048_v11 = vld [vmem:[%s2931_s20 + $0x90] sm:$0xff]  ;;  %v2938_v12 = vld [vmem:[%s2931_s20 + $0xa0] sm:$0xff]  ;;  %v2775_v45 = vld [vmem:[%s3343_s1 + $0xa8] sm:$0xff]   ;;  %s3285_s22 = scalar_lea.vmem %s3346_s4, %s2729_s14 }
  0x13   : > { %2523 = vmatpush3.bf16.msra.mxu1 %v2758_v3  ;;  %2500 = vmatprep.subr.bf16.mxu0 %v2759_v4  ;;  %v264_v13 = vld [vmem:[%s2931_s20] sm:$0xff]  ;;  %v2352_v15 = vpack.c.bf16 %v2938_v12, %v2048_v11  ;;  %v2946_v16 = vld [vmem:[%s2931_s20 + $0x10] sm:$0xff]  ;;  %v2776_v49 = vld [vmem:[%s3343_s1 + $0xe8] sm:$0xff]  }
  0x14   : > { %2524 = vmatprep.subr.bf16.mxu1 %v2760_v5  ;;  %v2949_v17 = vld [vmem:[%s2931_s20 + $0xb0] sm:$0xff]  ;;  %v2356_v18 = vpack.c.bf16 %v2946_v16, %v264_v13  ;;  %v2953_v19 = vld [vmem:[%s2931_s20 + $0x20] sm:$0xff]  ;;  %v2779_v61 = vld [vmem:[%s3343_s1 + $0x98] sm:$0xff]  }
  0x15   : > { %v2380_v20 = vpack.c.bf16 %v2949_v17, %v2938_v12  ;;  %2512 = vmatprep.mubr.bf16.mxu0 %v2352_v15  ;;  %v2376_v21 = vpack.c.bf16 %v2953_v19, %v2946_v16  ;;  %v2972_v26 = vld [vmem:[%s2931_s20 + $0xc0] sm:$0xff]  ;;  %v2975_v27 = vld [vmem:[%s2931_s20 + $0x30] sm:$0xff]  ;;  %v2780_v3 = vld [vmem:[%s3343_s1 + $0xd8] sm:$0xff]  }
  0x16   : > { %2501 = vmatpush3.bf16.msra.mxu0 %v2759_v4  ;;  %2536 = vmatprep.mubr.bf16.mxu1 %v2356_v18  ;;  %v2981_v29 = vld [vmem:[%s2931_s20 + $0xd0] sm:$0xff]  ;;  %v2987_v31 = vld [vmem:[%s2931_s20 + $0xe0] sm:$0xff]  ;;  %v2353_v34 = vpack.c.bf16 %v2972_v26, %v2949_v17  ;;  %v2357_v39 = vpack.c.bf16 %v2975_v27, %v2953_v19  ;;  %v2787_v15 = vld [vmem:[%s3343_s1 + $0x138] sm:$0xff]  }
  0x17   : > { %2525 = vmatpush3.bf16.msra.mxu1 %v2760_v5  ;;  %2502 = vmatprep.subr.bf16.mxu0 %v2761_v6  ;;  %v2990_v32 = vld [vmem:[%s2931_s20 + $0x40] sm:$0xff]  ;;  %v2381_v33 = vpack.c.bf16 %v2981_v29, %v2972_v26  ;;  %v2997_v35 = vld [vmem:[%s2931_s20 + $0x50] sm:$0xff]  ;;  %v2354_v44 = vpack.c.bf16 %v2987_v31, %v2981_v29  ;;  %v2788_v18 = vld [vmem:[%s3343_s1 + $0x178] sm:$0xff]  }
  0x18   : > { %2526 = vmatprep.subr.bf16.mxu1 %v2762_v7  ;;  %v3000_v36 = vld [vmem:[%s2931_s20 + $0xf0] sm:$0xff]  ;;  %v3003_v37 = vld [vmem:[%s2931_s20 + $0x60] sm:$0xff]  ;;  %v2377_v38 = vpack.c.bf16 %v2990_v32, %v2975_v27  ;;  %v2358_v46 = vpack.c.bf16 %v2997_v35, %v2990_v32  ;;  %v2815_v12 = vld [vmem:[%s3343_s1 + $0x188] sm:$0xff]  }
  0x19   : > { %v2378_v40 = vpack.c.bf16 %v3003_v37, %v2997_v35  ;;  %v2382_v41 = vpack.c.bf16 %v3000_v36, %v2987_v31  ;;  %v2773_v42 = vld [vmem:[%s3343_s1 + $0xb0] sm:$0xff]   ;;  %v3027_v47 = vld [vmem:[%s2931_s20 + $0x100] sm:$0xff]  ;;  %v2816_v16 = vld [vmem:[%s3343_s1 + $0x1c8] sm:$0xff]  }
  0x1a   : > { %2503 = vmatpush3.bf16.msra.mxu0 %v2761_v6  ;;  %v2774_v43 = vld [vmem:[%s3343_s1 + $0xf0] sm:$0xff]   ;;  %v2355_v50 = vpack.c.bf16 %v3027_v47, %v3000_v36  ;;  %v604_v51 = vld [vmem:[%s2931_s20 + $0x1] sm:$0xff]  ;;  %v2823_v31 = vld [vmem:[%s3343_s1 + $0x218] sm:$0xff]  }
  0x1b   : > { %2527 = vmatpush3.bf16.msra.mxu1 %v2762_v7  ;;  %2504 = vmatprep.subr.bf16.mxu0 %v2763_v8  ;;  %v3030_v48 = vld [vmem:[%s2931_s20 + $0x70] sm:$0xff]  ;;  %v3042_v53 = vld [vmem:[%s2931_s20 + $0x21] sm:$0xff] }
  0x1c   : > { %2528 = vmatprep.subr.bf16.mxu1 %v2764_v9  ;;  %v3039_v52 = vld [vmem:[%s2931_s20 + $0x11] sm:$0xff]  ;;  %v2359_v54 = vpack.c.bf16 %v3030_v48, %v3003_v37  ;;  %v2124_v55 = vld [vmem:[%s2931_s20 + $0x120] sm:$0xff] }
  0x1d   : > { %v2125_v56 = vld [vmem:[%s2931_s20 + $0x130] sm:$0xff]  ;;  %v2384_v57 = vpack.c.bf16 %v3042_v53, %v3039_v52  ;;  %v2777_v58 = vld [vmem:[%s3343_s1 + $0xa0] sm:$0xff]   ;;  %v2360_v60 = vpack.c.bf16 %v3039_v52, %v604_v51 }
  0x1e   : > { %2505 = vmatpush3.bf16.msra.mxu0 %v2763_v8  ;;  %v2778_v59 = vld [vmem:[%s3343_s1 + $0xe0] sm:$0xff]   ;;  %v2364_v62 = vpack.c.bf16 %v2125_v56, %v2124_v55  ;;  %v3061_v63 = vld [vmem:[%s2931_s20 + $0x31] sm:$0xff]  ;;  %v2783_v8 = vld [vmem:[%s3343_s1 + $0x88] sm:$0xff]  }
  0x1f   : > { %2529 = vmatpush3.bf16.msra.mxu1 %v2764_v9  ;;  %2506 = vmatprep.subr.bf16.mxu0 %v2765_v10  ;;  %v3064_v0 = vld [vmem:[%s2931_s20 + $0x41] sm:$0xff]  ;;  %v3067_v1 = vld [vmem:[%s2931_s20 + $0x51] sm:$0xff] }
  0x20   : > { %2530 = vmatprep.subr.bf16.mxu1 %v2766_v14  ;;  %v3070_v2 = vld [vmem:[%s2931_s20 + $0x61] sm:$0xff]  ;;  %v2385_v5 = vpack.c.bf16 %v3064_v0, %v3061_v63  ;;  %v2781_v6 = vld [vmem:[%s3343_s1 + $0x90] sm:$0xff]  }
  0x21   : > { %v2386_v4 = vpack.c.bf16 %v3070_v2, %v3067_v1  ;;  %v2782_v7 = vld [vmem:[%s3343_s1 + $0xd0] sm:$0xff]   ;;  %v2784_v9 = vld [vmem:[%s3343_s1 + $0xc8] sm:$0xff]   ;;  %v2786_v11 = vld [vmem:[%s3343_s1 + $0xc0] sm:$0xff]  }
  0x22   : > { %2507 = vmatpush3.bf16.msra.mxu0 %v2765_v10  ;;  %v2785_v10 = vld [vmem:[%s3343_s1 + $0x80] sm:$0xff]   ;;  %v2197_v56 = vld [vmem:[%s2931_s20 + $0x131] sm:$0xff] }
  0x23   : > { %2531 = vmatpush3.bf16.msra.mxu1 %v2766_v14  ;;  %2508 = vmatprep.subr.bf16.mxu0 %v2767_v22  ;;  %v2126_v13 = vld [vmem:[%s2931_s20 + $0x140] sm:$0xff]  ;;  %v2127_v14 = vld [vmem:[%s2931_s20 + $0x150] sm:$0xff] }
  0x24   : > { %2532 = vmatprep.subr.bf16.mxu1 %v2768_v23  ;;  %v2817_v17 = vld [vmem:[%s3343_s1 + $0x180] sm:$0xff]   ;;  %v2824_v32 = vld [vmem:[%s3343_s1 + $0x210] sm:$0xff]  }
  0x25   : > { %v2818_v19 = vld [vmem:[%s3343_s1 + $0x1c0] sm:$0xff]  }
  0x26   : > { %2509 = vmatpush3.bf16.msra.mxu0 %v2767_v22  ;;  %v2361_v22 = vpack.c.bf16 %v3061_v63, %v3042_v53  ;;  %v2822_v29 = vld [vmem:[%s3343_s1 + $0x220] sm:$0xff]  }
  0x27   : > { %2533 = vmatpush3.bf16.msra.mxu1 %v2768_v23  ;;  %2510 = vmatprep.subr.bf16.mxu0 %v2769_v24  ;;  %v2128_v23 = vld [vmem:[%s2931_s20 + $0x160] sm:$0xff] }
  0x28   : > { %2534 = vmatprep.subr.bf16.mxu1 %v2770_v25  ;;  %v2826_v35 = vld [vmem:[%s3343_s1 + $0x200] sm:$0xff]  }
  0x29   : > { %v2311_v36 = vld [vmem:[%s2931_s20 + $0x81] sm:$0xff] }
  0x2a   : > { %2511 = vmatpush3.bf16.msra.mxu0 %v2769_v24  ;;  %v2365_v24 = vpack.c.bf16 %v2127_v14, %v2126_v13  ;;  %v2162_v13 = vld [vmem:[%s2931_s20 + $0x1d0] sm:$0xff]  ;;  %v2163_v14 = vld [vmem:[%s2931_s20 + $0x1e0] sm:$0xff] }
  0x2b   : > { %2535 = vmatpush3.bf16.msra.mxu1 %v2770_v25  ;;  %2544 = vmatprep.subr.bf16.mxu0 %v2771_v28  ;;  %v2129_v25 = vld [vmem:[%s2931_s20 + $0x170] sm:$0xff] }
  0x2c   : > { %2568 = vmatprep.subr.bf16.mxu1 %v2772_v30 }
  0x2d   : > { %2513 = vmatmul.mubr.bf16.vlgmr.msra.gmra.mxu0 %v2353_v34  ;;  %v2362_v34 = vpack.c.bf16 %v3067_v1, %v3064_v0 }
  0x2e   : > { %2537 = vmatmul.mubr.bf16.vlgmr.msra.gmra.mxu1 %v2357_v39  ;;  %2545 = vmatpush3.bf16.msra.mxu0 %v2771_v28  ;;  %v2789_v28 = vld [vmem:[%s3343_s1 + $0x130] sm:$0xff]  }
  0x2f   : > { %2569 = vmatpush3.bf16.msra.mxu1 %v2772_v30  ;;  %2546 = vmatprep.subr.bf16.mxu0 %v2773_v42  ;;  %v2790_v30 = vld [vmem:[%s3343_s1 + $0x170] sm:$0xff]  }
  0x30   : > { %2570 = vmatprep.subr.bf16.mxu1 %v2774_v43  ;;  %2516 = vmatprep.mubr.bf16.mxu0 %v2354_v44  ;;  %v3118_v39 = vld [vmem:[%s2931_s20 + $0x71] sm:$0xff]  ;;  %v2130_v44 = vld [vmem:[%s2931_s20 + $0x180] sm:$0xff] }
  0x31   : > { %2540 = vmatprep.mubr.bf16.mxu1 %v2358_v46  ;;  %v2792_v46 = vld [vmem:[%s3343_s1 + $0x168] sm:$0xff]   ;;  %v2363_v51 = vpack.c.bf16 %v3118_v39, %v3070_v2  ;;  %v2387_v37 = vpack.c.bf16 %v2311_v36, %v3118_v39 }
  0x32   : > { %2547 = vmatpush3.bf16.msra.mxu0 %v2773_v42  ;;  %v2366_v42 = vpack.c.bf16 %v2129_v25, %v2128_v23  ;;  %v2804_v23 = vld [vmem:[%s3343_s1 + $0x1f8] sm:$0xff]   ;;  %v2164_v25 = vld [vmem:[%s2931_s20 + $0x1f0] sm:$0xff] }
  0x33   : > { %2571 = vmatpush3.bf16.msra.mxu1 %v2774_v43  ;;  %2548 = vmatprep.subr.bf16.mxu0 %v2775_v45  ;;  %v2791_v43 = vld [vmem:[%s3343_s1 + $0x128] sm:$0xff]  }
  0x34   : > { %2572 = vmatprep.subr.bf16.mxu1 %v2776_v49 }
  0x35   : > { %2517 = vmatmul.mubr.bf16.gmra.mxu0 %v2355_v50  ;;  %v2161_v50 = vld [vmem:[%s2931_s20 + $0x1c0] sm:$0xff] }
  0x36   : > { %2549 = vmatpush3.bf16.msra.mxu0 %v2775_v45  ;;  %2541 = vmatmul.mubr.bf16.gmra.mxu1 %v2359_v54  ;;  %v2131_v45 = vld [vmem:[%s2931_s20 + $0x190] sm:$0xff]  ;;  %v2196_v54 = vld [vmem:[%s2931_s20 + $0x121] sm:$0xff] }
  0x37   : > { %2573 = vmatpush3.bf16.msra.mxu1 %v2776_v49  ;;  %2550 = vmatprep.subr.bf16.mxu0 %v2777_v58  ;;  %v2160_v49 = vld [vmem:[%s2931_s20 + $0x1b0] sm:$0xff]  ;;  %v2367_v55 = vpack.c.bf16 %v2131_v45, %v2130_v44 }
  0x38   : > { %2574 = vmatprep.subr.bf16.mxu1 %v2778_v59  ;;  %2560 = vmatprep.mubr.bf16.mxu0 %v2360_v60  ;;  %v2368_v60 = vpack.c.bf16 %v2161_v50, %v2160_v49  ;;  %v2806_v44 = vld [vmem:[%s3343_s1 + $0x1f0] sm:$0xff]   ;;  %v2167_v50 = vld [vmem:[%s2931_s20 + $0x220] sm:$0xff] }
  0x39   : > { %2584 = vmatprep.mubr.bf16.mxu1 %v2364_v62  ;;  %v2795_v62 = vld [vmem:[%s3343_s1 + $0x118] sm:$0xff]   ;;  %v2166_v49 = vld [vmem:[%s2931_s20 + $0x210] sm:$0xff] }
  0x3a   : > { %2551 = vmatpush3.bf16.msra.mxu0 %v2777_v58  ;;  %v2793_v58 = vld [vmem:[%s3343_s1 + $0x120] sm:$0xff]  }
  0x3b   : > { %2575 = vmatpush3.bf16.msra.mxu1 %v2778_v59  ;;  %2552 = vmatprep.subr.bf16.mxu0 %v2779_v61  ;;  %v2794_v59 = vld [vmem:[%s3343_s1 + $0x160] sm:$0xff]  }
  0x3c   : > { %2576 = vmatprep.subr.bf16.mxu1 %v2780_v3 }
  0x3e   : > { %2553 = vmatpush3.bf16.msra.mxu0 %v2779_v61  ;;  %v2372_v61 = vpack.c.bf16 %v2197_v56, %v2196_v54  ;;  %v2202_v54 = vld [vmem:[%s2931_s20 + $0x181] sm:$0xff] }
  0x3f   : > { %2577 = vmatpush3.bf16.msra.mxu1 %v2780_v3  ;;  %2554 = vmatprep.subr.bf16.mxu0 %v2781_v6  ;;  %v2796_v3 = vld [vmem:[%s3343_s1 + $0x158] sm:$0xff]   ;;  %v2808_v56 = vld [vmem:[%s3343_s1 + $0x1e8] sm:$0xff]  }
  0x40   : > { %2578 = vmatprep.subr.bf16.mxu1 %v2782_v7 }
  0x42   : > { %2555 = vmatpush3.bf16.msra.mxu0 %v2781_v6  ;;  %v2797_v6 = vld [vmem:[%s3343_s1 + $0x110] sm:$0xff]  }
  0x43   : > { %2579 = vmatpush3.bf16.msra.mxu1 %v2782_v7  ;;  %2556 = vmatprep.subr.bf16.mxu0 %v2783_v8  ;;  %v2798_v7 = vld [vmem:[%s3343_s1 + $0x150] sm:$0xff]  }
  0x44   : > { %2580 = vmatprep.subr.bf16.mxu1 %v2784_v9 }
  0x46   : > { %2557 = vmatpush3.bf16.msra.mxu0 %v2783_v8  ;;  %v2799_v8 = vld [vmem:[%s3343_s1 + $0x108] sm:$0xff]  }
  0x47   : > { %2581 = vmatpush3.bf16.msra.mxu1 %v2784_v9  ;;  %2558 = vmatprep.subr.bf16.mxu0 %v2785_v10  ;;  %v2800_v9 = vld [vmem:[%s3343_s1 + $0x148] sm:$0xff]  }
  0x48   : > { %2582 = vmatprep.subr.bf16.mxu1 %v2786_v11 }
  0x4a   : > { %2559 = vmatpush3.bf16.msra.mxu0 %v2785_v10  ;;  %v2801_v10 = vld [vmem:[%s3343_s1 + $0x100] sm:$0xff]  }
  0x4b   : > { %2583 = vmatpush3.bf16.msra.mxu1 %v2786_v11  ;;  %2592 = vmatprep.subr.bf16.mxu0 %v2787_v15  ;;  %v2802_v11 = vld [vmem:[%s3343_s1 + $0x140] sm:$0xff]  }
  0x4c   : > { %2616 = vmatprep.subr.bf16.mxu1 %v2788_v18 }
  0x4d   : > { %2561 = vmatmul.mubr.bf16.vlgmr.msra.gmra.mxu0 %v2361_v22  ;;  %v2803_v22 = vld [vmem:[%s3343_s1 + $0x1b8] sm:$0xff]  }
  0x4e   : > { %2585 = vmatmul.mubr.bf16.vlgmr.msra.gmra.mxu1 %v2365_v24  ;;  %2593 = vmatpush3.bf16.msra.mxu0 %v2787_v15  ;;  %v2198_v15 = vld [vmem:[%s2931_s20 + $0x141] sm:$0xff]  ;;  %v2369_v24 = vpack.c.bf16 %v2163_v14, %v2162_v13 }
  0x4f   : > { %2617 = vmatpush3.bf16.msra.mxu1 %v2788_v18  ;;  %2594 = vmatprep.subr.bf16.mxu0 %v2789_v28  ;;  %v2199_v18 = vld [vmem:[%s2931_s20 + $0x151] sm:$0xff] }
  0x50   : > { %2618 = vmatprep.subr.bf16.mxu1 %v2790_v30  ;;  %2564 = vmatprep.mubr.bf16.mxu0 %v2362_v34  ;;  %v2200_v34 = vld [vmem:[%s2931_s20 + $0x161] sm:$0xff] }
  0x51   : > { %2588 = vmatprep.mubr.bf16.mxu1 %v2366_v42  ;;  %v2201_v42 = vld [vmem:[%s2931_s20 + $0x171] sm:$0xff] }
  0x52   : > { %2595 = vmatpush3.bf16.msra.mxu0 %v2789_v28  ;;  %v2165_v28 = vld [vmem:[%s2931_s20 + $0x200] sm:$0xff] }
  0x53   : > { %2619 = vmatpush3.bf16.msra.mxu1 %v2790_v30  ;;  %2596 = vmatprep.subr.bf16.mxu0 %v2791_v43  ;;  %v2373_v30 = vpack.c.bf16 %v2199_v18, %v2198_v15  ;;  %v2370_v45 = vpack.c.bf16 %v2165_v28, %v2164_v25 }
  0x54   : > { %2620 = vmatprep.subr.bf16.mxu1 %v2792_v46 }
  0x55   : > { %2565 = vmatmul.mubr.bf16.gmra.mxu0 %v2363_v51  ;;  %v2807_v51 = vld [vmem:[%s3343_s1 + $0x1a8] sm:$0xff]  }
  0x56   : > { %2597 = vmatpush3.bf16.msra.mxu0 %v2791_v43  ;;  %2589 = vmatmul.mubr.bf16.gmra.mxu1 %v2367_v55  ;;  %v2805_v43 = vld [vmem:[%s3343_s1 + $0x1b0] sm:$0xff]  }
  0x57   : > { %2621 = vmatpush3.bf16.msra.mxu1 %v2792_v46  ;;  %2598 = vmatprep.subr.bf16.mxu0 %v2793_v58  ;;  %v2374_v46 = vpack.c.bf16 %v2201_v42, %v2200_v34  ;;  %v2203_v55 = vld [vmem:[%s2931_s20 + $0x191] sm:$0xff] }
  0x58   : > { %2622 = vmatprep.subr.bf16.mxu1 %v2794_v59  ;;  %2608 = vmatprep.mubr.bf16.mxu0 %v2368_v60  ;;  %v2809_v60 = vld [vmem:[%s3343_s1 + $0x1a0] sm:$0xff]  }
  0x59   : > { %2632 = vmatprep.mubr.bf16.mxu1 %v2372_v61  ;;  %v2810_v61 = vld [vmem:[%s3343_s1 + $0x1e0] sm:$0xff]  }
  0x5a   : > { %2599 = vmatpush3.bf16.msra.mxu0 %v2793_v58  ;;  %v2371_v58 = vpack.c.bf16 %v2167_v50, %v2166_v49 }
  0x5b   : > { %2623 = vmatpush3.bf16.msra.mxu1 %v2794_v59  ;;  %2600 = vmatprep.subr.bf16.mxu0 %v2795_v62  ;;  %v2375_v59 = vpack.c.bf16 %v2203_v55, %v2202_v54 }
  0x5c   : > { %2624 = vmatprep.subr.bf16.mxu1 %v2796_v3 }
  0x5e   : > { %2601 = vmatpush3.bf16.msra.mxu0 %v2795_v62  ;;  %v2811_v62 = vld [vmem:[%s3343_s1 + $0x198] sm:$0xff]  }
  0x5f   : > { %2625 = vmatpush3.bf16.msra.mxu1 %v2796_v3  ;;  %2602 = vmatprep.subr.bf16.mxu0 %v2797_v6  ;;  %v2812_v3 = vld [vmem:[%s3343_s1 + $0x1d8] sm:$0xff]  }
  0x60   : > { %2626 = vmatprep.subr.bf16.mxu1 %v2798_v7 }
  0x62   : > { %2603 = vmatpush3.bf16.msra.mxu0 %v2797_v6  ;;  %v2813_v6 = vld [vmem:[%s3343_s1 + $0x190] sm:$0xff]  }
  0x63   : > { %2627 = vmatpush3.bf16.msra.mxu1 %v2798_v7  ;;  %2604 = vmatprep.subr.bf16.mxu0 %v2799_v8  ;;  %v2814_v7 = vld [vmem:[%s3343_s1 + $0x1d0] sm:$0xff]  }
  0x64   : > { %2628 = vmatprep.subr.bf16.mxu1 %v2800_v9 }
  0x66   : > { %2605 = vmatpush3.bf16.msra.mxu0 %v2799_v8  ;;  %v2239_v8 = vld [vmem:[%s2931_s20 + $0x80] sm:$0xff] }
  0x67   : > { %2629 = vmatpush3.bf16.msra.mxu1 %v2800_v9  ;;  %2606 = vmatprep.subr.bf16.mxu0 %v2801_v10  ;;  %v2821_v9 = vld [vmem:[%s3343_s1 + $0x228] sm:$0xff]   ;;  %v2379_v27 = vpack.c.bf16 %v2239_v8, %v3030_v48 }
  0x68   : > { %2630 = vmatprep.subr.bf16.mxu1 %v2802_v11 }
  0x6a   : > { %2607 = vmatpush3.bf16.msra.mxu0 %v2801_v10  ;;  %v2275_v10 = vld [vmem:[%s2931_s20 + $0x110] sm:$0xff] }
  0x6b   : > { %2631 = vmatpush3.bf16.msra.mxu1 %v2802_v11  ;;  %2640 = vmatprep.subr.bf16.mxu0 %v2803_v22  ;;  %v2383_v26 = vpack.c.bf16 %v2275_v10, %v3027_v47 }
  0x6c   : > { %2664 = vmatprep.subr.bf16.mxu1 %v2804_v23 }
  0x6d   : > { %2609 = vmatmul.mubr.bf16.vlgmr.msra.gmra.mxu0 %v2369_v24 }
  0x6e   : > { %2633 = vmatmul.mubr.bf16.vlgmr.msra.gmra.mxu1 %v2373_v30  ;;  %2641 = vmatpush3.bf16.msra.mxu0 %v2803_v22 }
  0x6f   : > { %2665 = vmatpush3.bf16.msra.mxu1 %v2804_v23  ;;  %2642 = vmatprep.subr.bf16.mxu0 %v2805_v43 }
  0x70   : > { %2666 = vmatprep.subr.bf16.mxu1 %v2806_v44  ;;  %2612 = vmatprep.mubr.bf16.mxu0 %v2370_v45 }
  0x71   : > { %2636 = vmatprep.mubr.bf16.mxu1 %v2374_v46 }
  0x72   : > { %2643 = vmatpush3.bf16.msra.mxu0 %v2805_v43 }
  0x73   : > { %2667 = vmatpush3.bf16.msra.mxu1 %v2806_v44  ;;  %2644 = vmatprep.subr.bf16.mxu0 %v2807_v51 }
  0x74   : > { %2668 = vmatprep.subr.bf16.mxu1 %v2808_v56 }
  0x75   : > { %2613 = vmatmul.mubr.bf16.gmra.mxu0 %v2371_v58 }
  0x76   : > { %2645 = vmatpush3.bf16.msra.mxu0 %v2807_v51  ;;  %2637 = vmatmul.mubr.bf16.gmra.mxu1 %v2375_v59 }
  0x77   : > { %2669 = vmatpush3.bf16.msra.mxu1 %v2808_v56  ;;  %2646 = vmatprep.subr.bf16.mxu0 %v2809_v60 }
  0x78   : > { %2670 = vmatprep.subr.bf16.mxu1 %v2810_v61  ;;  %2656 = vmatprep.mubr.bf16.mxu0 %v2376_v21  ;;  %v2820_v21 = vld [vmem:[%s3343_s1 + $0x230] sm:$0xff]  }
  0x79   : > { %2680 = vmatprep.mubr.bf16.mxu1 %v2380_v20  ;;  %v2819_v20 = vld [vmem:[%s3343_s1 + $0x238] sm:$0xff]  }
  0x7a   : > { %2647 = vmatpush3.bf16.msra.mxu0 %v2809_v60 }
  0x7b   : > { %2671 = vmatpush3.bf16.msra.mxu1 %v2810_v61  ;;  %2648 = vmatprep.subr.bf16.mxu0 %v2811_v62 }
  0x7c   : > { %2672 = vmatprep.subr.bf16.mxu1 %v2812_v3 }
  0x7e   : > { %2649 = vmatpush3.bf16.msra.mxu0 %v2811_v62 }
  0x7f   : > { %2673 = vmatpush3.bf16.msra.mxu1 %v2812_v3  ;;  %2650 = vmatprep.subr.bf16.mxu0 %v2813_v6 }
  0x80   : > { %2674 = vmatprep.subr.bf16.mxu1 %v2814_v7 }
  0x82   : > { %2651 = vmatpush3.bf16.msra.mxu0 %v2813_v6 }
  0x83   : > { %2675 = vmatpush3.bf16.msra.mxu1 %v2814_v7  ;;  %2652 = vmatprep.subr.bf16.mxu0 %v2815_v12 }
  0x84   : > { %2676 = vmatprep.subr.bf16.mxu1 %v2816_v16 }
  0x86   : > { %2653 = vmatpush3.bf16.msra.mxu0 %v2815_v12 }
  0x87   : > { %2677 = vmatpush3.bf16.msra.mxu1 %v2816_v16  ;;  %2654 = vmatprep.subr.bf16.mxu0 %v2817_v17 }
  0x88   : > { %2678 = vmatprep.subr.bf16.mxu1 %v2818_v19 }
  0x8a   : > { %2655 = vmatpush3.bf16.msra.mxu0 %v2817_v17 }
  0x8b   : > { %2679 = vmatpush3.bf16.msra.mxu1 %v2818_v19  ;;  %2688 = vmatprep.subr.bf16.mxu0 %v2819_v20 }
  0x8c   : > { %2712 = vmatprep.subr.bf16.mxu1 %v2819_v20 }
  0x8d   : > { %2657 = vmatmul.mubr.bf16.vlgmr.msra.gmra.mxu0 %v2377_v38  ;;  %v2851_v38 = vmov 0.0  }
  0x8e   : > { %2681 = vmatmul.mubr.bf16.vlgmr.msra.gmra.mxu1 %v2381_v33  ;;  %2689 = vmatpush3.bf16.msra.mxu0 %v2819_v20  ;;  %v2825_v33 = vld [vmem:[%s3343_s1 + $0x208] sm:$0xff]   ;;  %1892 = vst [vmem:[%s3285_s22] sm:$0xff] %v2851_v38  ;;  %1893 = vst [vmem:[%s3285_s22 + $0x8] sm:$0x3] %v2851_v38 }
  0x8f   : > { %2720 = vmatpush3.bf16.msra.mxu1 %v2819_v20  ;;  %2690 = vmatprep.subr.bf16.mxu0 %v2820_v21  ;;  %1898 = vst [vmem:[%s3285_s22 + $0x30] sm:$0xff] %v2851_v38  ;;  %1899 = vst [vmem:[%s3285_s22 + $0x38] sm:$0x3] %v2851_v38 }
  0x90   : > { %2713 = vmatprep.subr.bf16.mxu1 %v2820_v21  ;;  %2660 = vmatprep.mubr.bf16.mxu0 %v2378_v40  ;;  %1910 = vst [vmem:[%s3285_s22 + $0x90] sm:$0xff] %v2851_v38  ;;  %1911 = vst [vmem:[%s3285_s22 + $0x98] sm:$0x3] %v2851_v38 }
  0x91   : > { %2684 = vmatprep.mubr.bf16.mxu1 %v2382_v41  ;;  %1894 = vst [vmem:[%s3285_s22 + $0x10] sm:$0xff] %v2851_v38  ;;  %1895 = vst [vmem:[%s3285_s22 + $0x18] sm:$0x3] %v2851_v38 }
  0x92   : > { %2691 = vmatpush3.bf16.msra.mxu0 %v2820_v21  ;;  %1896 = vst [vmem:[%s3285_s22 + $0x20] sm:$0xff] %v2851_v38  ;;  %1897 = vst [vmem:[%s3285_s22 + $0x28] sm:$0x3] %v2851_v38 }
  0x93   : > { %2721 = vmatpush3.bf16.msra.mxu1 %v2820_v21  ;;  %2692 = vmatprep.subr.bf16.mxu0 %v2821_v9  ;;  %1900 = vst [vmem:[%s3285_s22 + $0x40] sm:$0xff] %v2851_v38  ;;  %1901 = vst [vmem:[%s3285_s22 + $0x48] sm:$0x3] %v2851_v38 }
  0x94   : > { %2714 = vmatprep.subr.bf16.mxu1 %v2821_v9  ;;  %1902 = vst [vmem:[%s3285_s22 + $0x50] sm:$0xff] %v2851_v38  ;;  %1903 = vst [vmem:[%s3285_s22 + $0x58] sm:$0x3] %v2851_v38 }
  0x95   : > { %2661 = vmatmul.mubr.bf16.gmra.mxu0 %v2379_v27  ;;  %1904 = vst [vmem:[%s3285_s22 + $0x60] sm:$0xff] %v2851_v38  ;;  %1905 = vst [vmem:[%s3285_s22 + $0x68] sm:$0x3] %v2851_v38 }
  0x96   : > { %2693 = vmatpush3.bf16.msra.mxu0 %v2821_v9  ;;  %2685 = vmatmul.mubr.bf16.gmra.mxu1 %v2383_v26  ;;  %1906 = vst [vmem:[%s3285_s22 + $0x70] sm:$0xff] %v2851_v38  ;;  %1907 = vst [vmem:[%s3285_s22 + $0x78] sm:$0x3] %v2851_v38 }
  0x97   : > { %2722 = vmatpush3.bf16.msra.mxu1 %v2821_v9  ;;  %2694 = vmatprep.subr.bf16.mxu0 %v2822_v29  ;;  %1908 = vst [vmem:[%s3285_s22 + $0x80] sm:$0xff] %v2851_v38  ;;  %1909 = vst [vmem:[%s3285_s22 + $0x88] sm:$0x3] %v2851_v38 }
  0x98   : > { %2715 = vmatprep.subr.bf16.mxu1 %v2822_v29  ;;  %2704 = vmatprep.mubr.bf16.mxu0 %v2384_v57 }
  0x99   : > { %2708 = vmatprep.mubr.bf16.mxu1 %v2386_v4 }
  0x9a   : > { %2695 = vmatpush3.bf16.msra.mxu0 %v2822_v29 }
  0x9b   : > { %2723 = vmatpush3.bf16.msra.mxu1 %v2822_v29  ;;  %2696 = vmatprep.subr.bf16.mxu0 %v2823_v31 }
  0x9c   : > { %2716 = vmatprep.subr.bf16.mxu1 %v2823_v31 }
  0x9e   : > { %2697 = vmatpush3.bf16.msra.mxu0 %v2823_v31 }
  0x9f   : > { %2724 = vmatpush3.bf16.msra.mxu1 %v2823_v31  ;;  %2698 = vmatprep.subr.bf16.mxu0 %v2824_v32 }
  0xa0   : > { %2717 = vmatprep.subr.bf16.mxu1 %v2824_v32 }
  0xa2   : > { %2699 = vmatpush3.bf16.msra.mxu0 %v2824_v32 }
  0xa3   : > { %2725 = vmatpush3.bf16.msra.mxu1 %v2824_v32  ;;  %2700 = vmatprep.subr.bf16.mxu0 %v2825_v33 }
  0xa4   : > { %2718 = vmatprep.subr.bf16.mxu1 %v2825_v33 }
  0xa6   : > { %2701 = vmatpush3.bf16.msra.mxu0 %v2825_v33 }
  0xa7   : > { %2726 = vmatpush3.bf16.msra.mxu1 %v2825_v33  ;;  %2702 = vmatprep.subr.bf16.mxu0 %v2826_v35 }
  0xa8   : > { %2719 = vmatprep.subr.bf16.mxu1 %v2826_v35 }
  0xaa   : > { %2703 = vmatpush3.bf16.msra.mxu0 %v2826_v35 }
  0xab   : > { %2727 = vmatpush3.bf16.msra.mxu1 %v2826_v35 }
  0xad   : > { %2705 = vmatmul.mubr.bf16.vlgmr.msra.gmra.mxu0 %v2385_v5 }
  0xae   : > { %2709 = vmatmul.mubr.bf16.vlgmr.msra.gmra.mxu1 %v2387_v37 }
  0xed   : > { %v2514_v40 = vpop.f32.mrf.mxu0 }
  0xee   : > { %v2538_v47 = vpop.f32.mrf.mxu1 }
  0xef   : > { %v436_v41 = vpop.f32.mrf.mxu0  ;;  %v582_v10 = vadd.f32 %v2538_v47, %v2514_v40 }
  0xf0   : > { %v573_v52 = vpop.f32.mrf.mxu1 }
  0xf1   : > { %v2515_v48 = vpop.f32.mrf.mxu0  ;;  %v574_v31 = vadd.f32 %v573_v52, %v436_v41 }
  0xf2   : > { %v2539_v63 = vpop.f32.mrf.mxu1 }
  0xf3   : > { %v439_v53 = vpop.f32.mrf.mxu0  ;;  %v585_v36 = vadd.f32 %v2539_v63, %v2515_v48 }
  0xf4   : > { %v576_v1 = vpop.f32.mrf.mxu1 }
  0xf5   : > { %v2518_v57 = vpop.f32.mrf.mxu0  ;;  %v577_v47 = vadd.f32 %v576_v1, %v439_v53 }
  0xf6   : > { %v2542_v2 = vpop.f32.mrf.mxu1 }
  0xf7   : > { %v452_v0 = vpop.f32.mrf.mxu0  ;;  %v598_v26 = vadd.f32 %v2542_v2, %v2518_v57 }
  0xf8   : > { %v589_v5 = vpop.f32.mrf.mxu1 }
  0xf9   : > { %v2519_v4 = vpop.f32.mrf.mxu0  ;;  %v590_v33 = vadd.f32 %v589_v5, %v452_v0 }
  0xfa   : > { %v2543_v13 = vpop.f32.mrf.mxu1 }
  0xfb   : > { %v455_v39 = vpop.f32.mrf.mxu0 }
  0xfc   : > { %v592_v15 = vpop.f32.mrf.mxu1 }
  0xfd   : > { %v593_v41 = vadd.f32 %v592_v15, %v455_v39 }
 0x10d   : > { %v2562_v11 = vpop.f32.mrf.mxu0 }
 0x10e   : > { %v2586_v18 = vpop.f32.mrf.mxu1  ;;  %v776_v32 = vadd.f32 %v2562_v11, %v582_v10 }
 0x10f   : > { %v743_v14 = vpop.f32.mrf.mxu0 }
 0x110   : > { %v922_v23 = vpop.f32.mrf.mxu1  ;;  %v774_v37 = vadd.f32 %v743_v14, %v574_v31 }
 0x111   : > { %v2563_v22 = vpop.f32.mrf.mxu0 }
 0x112   : > { %v2587_v25 = vpop.f32.mrf.mxu1  ;;  %v777_v2 = vadd.f32 %v2563_v22, %v585_v36  ;;  %v953_v11 = vadd.f32 %v922_v23, %v774_v37 }
 0x113   : > { %v746_v24 = vpop.f32.mrf.mxu0 }
 0x114   : > { %v925_v30 = vpop.f32.mrf.mxu1  ;;  %v775_v0 = vadd.f32 %v746_v24, %v577_v47  ;;  %v956_v14 = vadd.f32 %v2587_v25, %v777_v2 }
 0x115   : > { %v2566_v28 = vpop.f32.mrf.mxu0 }
 0x116   : > { %v2590_v42 = vpop.f32.mrf.mxu1  ;;  %v780_v35 = vadd.f32 %v2566_v28, %v598_v26 }
 0x117   : > { %v759_v34 = vpop.f32.mrf.mxu0 }
 0x118   : > { %v938_v44 = vpop.f32.mrf.mxu1  ;;  %v959_v52 = vadd.f32 %v2590_v42, %v780_v35 }
 0x119   : > { %v2567_v43 = vpop.f32.mrf.mxu0 }
 0x11a   : > { %v2591_v46 = vpop.f32.mrf.mxu1 }
 0x11b   : > { %v762_v45 = vpop.f32.mrf.mxu0 }
 0x11c   : > { %v941_v50 = vpop.f32.mrf.mxu1  ;;  %v779_v28 = vadd.f32 %v762_v45, %v593_v41 }
 0x12d   : > { %v2610_v49 = vpop.f32.mrf.mxu0 }
 0x12e   : > { %v2634_v54 = vpop.f32.mrf.mxu1 }
 0x12f   : > { %v1101_v51 = vpop.f32.mrf.mxu0 }
 0x130   : > { %v1279_v56 = vpop.f32.mrf.mxu1  ;;  %v1132_v31 = vadd.f32 %v1101_v51, %v953_v11 }
 0x131   : > { %v2611_v55 = vpop.f32.mrf.mxu0 }
 0x132   : > { %v2635_v59 = vpop.f32.mrf.mxu1  ;;  %v1135_v1 = vadd.f32 %v2611_v55, %v956_v14  ;;  %v1310_v42 = vadd.f32 %v1279_v56, %v1132_v31 }
 0x133   : > { %v1104_v58 = vpop.f32.mrf.mxu0 }
 0x134   : > { %v3307_v61 = vpop.f32.mrf.mxu1 }
 0x135   : > { %v2614_v60 = vpop.f32.mrf.mxu0  ;;  %3347 = vst [vmem:[#allocation2_spill] sm:$0xff] %v3307_v61  ;;  %v601_v61 = vadd.f32 %v2543_v13, %v2519_v4 }
 0x136   : > { %v2638_v62 = vpop.f32.mrf.mxu1  ;;  %v1138_v48 = vadd.f32 %v2614_v60, %v959_v52  ;;  %v1313_v60 = vadd.f32 %v2635_v59, %v1135_v1 }
 0x137   : > { %v1117_v3 = vpop.f32.mrf.mxu0  ;;  %v781_v10 = vadd.f32 %v2567_v43, %v601_v61 }
 0x138   : > { %v1295_v6 = vpop.f32.mrf.mxu1  ;;  %v1316_v22 = vadd.f32 %v2638_v62, %v1138_v48 }
 0x139   : > { %v2615_v7 = vpop.f32.mrf.mxu0  ;;  %v960_v4 = vadd.f32 %v2591_v46, %v781_v10 }
 0x13a   : > { %v2639_v12 = vpop.f32.mrf.mxu1 }
 0x13b   : > { %v1120_v16 = vpop.f32.mrf.mxu0  ;;  %v1139_v39 = vadd.f32 %v2615_v7, %v960_v4 }
 0x13c   : > { %v1298_v19 = vpop.f32.mrf.mxu1 }
 0x13d   : > { %v1317_v51 = vadd.f32 %v2639_v12, %v1139_v39 }
 0x14d   : > { %v2658_v17 = vpop.f32.mrf.mxu0 }
 0x14e   : > { %v2682_v20 = vpop.f32.mrf.mxu1 }
 0x14f   : > { %v1458_v21 = vpop.f32.mrf.mxu0 }
 0x150   : > { %v3309_v8 = vpop.f32.mrf.mxu1  ;;  %v1489_v25 = vadd.f32 %v1458_v21, %v1310_v42 }
 0x151   : > { %3348 = vst [vmem:[#allocation3_spill] sm:$0xff] %v3309_v8  ;;  %v2659_v9 = vpop.f32.mrf.mxu0  ;;  %v778_v8 = vadd.f32 %v759_v34, %v590_v33  ;;  %v954_v34 = vadd.f32 %v925_v30, %v775_v0 }
 0x152   : > { %v3311_v27 = vpop.f32.mrf.mxu1  ;;  %v1492_v55 = vadd.f32 %v2659_v9, %v1313_v60 }
 0x153   : > { %3349 = vst [vmem:[#allocation4_spill] sm:$0xff] %v3311_v27  ;;  %v1461_v29 = vpop.f32.mrf.mxu0  ;;  %v955_v27 = vadd.f32 %v2586_v18, %v776_v32  ;;  %v957_v26 = vadd.f32 %v938_v44, %v778_v8  ;;  %v958_v18 = vadd.f32 %v941_v50, %v779_v28  ;;  %v1133_v23 = vadd.f32 %v1104_v58, %v954_v34  ;;  %v2340_v58 = vld [vmem:[%s3344_s2] ss:$0 sm:$0xff] }
 0x154   : > { %v3313_v38 = vpop.f32.mrf.mxu1 }
 0x155   : > { %3350 = vst [vmem:[#allocation5_spill] sm:$0xff] %v3313_v38  ;;  %v2662_v40 = vpop.f32.mrf.mxu0  ;;  %v1134_v5 = vadd.f32 %v2610_v49, %v955_v27  ;;  %v1136_v13 = vadd.f32 %v1117_v3, %v957_v26  ;;  %v1137_v45 = vadd.f32 %v1120_v16, %v958_v18  ;;  %v3351_v3 = vld [vmem:[#allocation2_spill] sm:$0xff] }
 0x156   : > { %v2686_v57 = vpop.f32.mrf.mxu1  ;;  %v1495_v49 = vadd.f32 %v2662_v40, %v1316_v22  ;;  %v1311_v30 = vadd.f32 %v3351_v3, %v1133_v23 }
 0x157   : > { %v1474_v63 = vpop.f32.mrf.mxu0  ;;  %v1312_v53 = vadd.f32 %v2634_v54, %v1134_v5  ;;  %v1314_v44 = vadd.f32 %v1295_v6, %v1136_v13  ;;  %v1315_v62 = vadd.f32 %v1298_v19, %v1137_v45 }
 0x158   : > { %v1653_v38 = vpop.f32.mrf.mxu1  ;;  %v1674_v7 = vadd.f32 %v2686_v57, %v1495_v49  ;;  %v3352_v6 = vld [vmem:[#allocation3_spill] sm:$0xff]  ;;  %v1490_v59 = vadd.f32 %v1461_v29, %v1311_v30 }
 0x159   : > { %v2663_v15 = vpop.f32.mrf.mxu0  ;;  %v1491_v24 = vadd.f32 %v2658_v17, %v1312_v53  ;;  %v1493_v61 = vadd.f32 %v1474_v63, %v1314_v44  ;;  %v1668_v16 = vadd.f32 %v3352_v6, %v1489_v25 }
 0x15a   : > { %v2687_v43 = vpop.f32.mrf.mxu1  ;;  %v1496_v8 = vadd.f32 %v2663_v15, %v1317_v51  ;;  %v3353_v32 = vld [vmem:[#allocation4_spill] sm:$0xff] }
 0x15b   : > { %v1477_v46 = vpop.f32.mrf.mxu0  ;;  %v1670_v54 = vadd.f32 %v2682_v20, %v1491_v24  ;;  %v1672_v21 = vadd.f32 %v1653_v38, %v1493_v61  ;;  %v2341_v20 = vld [vmem:[%s3345_s3] ss:$0 sm:$0xff]  ;;  %v1671_v33 = vadd.f32 %v3353_v32, %v1492_v55 }
 0x15c   : > { %v1656_v50 = vpop.f32.mrf.mxu1  ;;  %v1494_v27 = vadd.f32 %v1477_v46, %v1315_v62  ;;  %v1675_v40 = vadd.f32 %v2687_v43, %v1496_v8  ;;  %v3354_v29 = vld [vmem:[#allocation5_spill] sm:$0xff] }
 0x15d   : > { %v1669_v41 = vadd.f32 %v3354_v29, %v1490_v59 }
 0x15e   : > { %v1673_v0 = vadd.f32 %v1656_v50, %v1494_v27 }
 0x16d   : > { %v2706_v56 = vpop.f32.mrf.mxu0 }
 0x16e   : > { %v1848_v17 = vadd.f32 %v2706_v56, %v1670_v54  ;;  %v2710_v12 = vpop.f32.mrf.mxu1 }
 0x16f   : > { %v1852_v9 = vadd.f32 %v2710_v12, %v1674_v7  ;;  %v1815_v19 = vpop.f32.mrf.mxu0 }
 0x170   : > { %v1863_v35 = vmul.f32 %v2340_v58, %v1848_v17  ;;  %v1846_v36 = vadd.f32 %v1815_v19, %v1668_v16  ;;  %v1831_v37 = vpop.f32.mrf.mxu1 }
 0x171   : > { %v1867_v47 = vmul.f32 %v2340_v58, %v1852_v9  ;;  %v1850_v2 = vadd.f32 %v1831_v37, %v1672_v21  ;;  %v2707_v57 = vpop.f32.mrf.mxu0 }
 0x172   : > { %v1878_v52 = vadd.f32 %v2341_v20, %v1863_v35  ;;  %v1861_v38 = vmul.f32 %v2340_v58, %v1846_v36  ;;  %v1849_v10 = vadd.f32 %v2707_v57, %v1671_v33  ;;  %v2711_v11 = vpop.f32.mrf.mxu1 }
 0x173   : > { %v1882_v5 = vadd.f32 %v2341_v20, %v1867_v47  ;;  %v1865_v26 = vmul.f32 %v2340_v58, %v1850_v2  ;;  %v1853_v28 = vadd.f32 %v2711_v11, %v1675_v40  ;;  %v1818_v48 = vpop.f32.mrf.mxu0 }
 0x174   : > { %v1886_v63 = vmax.f32 %v1878_v52, 0.0  ;;  %v1876_v14 = vadd.f32 %v2341_v20, %v1861_v38  ;;  %v1864_v31 = vmul.f32 %v2340_v58, %v1849_v10  ;;  %v1847_v4 = vadd.f32 %v1818_v48, %v1669_v41  ;;  %v1834_v13 = vpop.f32.mrf.mxu1 }
 0x175   : > { %v1890_v34 = vmax.f32 %v1882_v5, 0.0  ;;  %v1880_v53 = vadd.f32 %v2341_v20, %v1865_v26  ;;  %v1868_v1 = vmul.f32 %v2340_v58, %v1853_v28  ;;  %v1851_v18 = vadd.f32 %v1834_v13, %v1673_v0 }
 0x176   : > { %2344 = vst [vmem:[%s3285_s22 + $0x31] sm:$0xff] %v1886_v63  ;;  %v1884_v22 = vmax.f32 %v1876_v14, 0.0  ;;  %v1879_v39 = vadd.f32 %v2341_v20, %v1864_v31  ;;  %v1862_v15 = vmul.f32 %v2340_v58, %v1847_v4 }
 0x177   : > { %2348 = vst [vmem:[%s3285_s22 + $0x71] sm:$0xff] %v1890_v34  ;;  %v1888_v42 = vmax.f32 %v1880_v53, 0.0  ;;  %v1883_v23 = vadd.f32 %v2341_v20, %v1868_v1  ;;  %v1866_v24 = vmul.f32 %v2340_v58, %v1851_v18 }
 0x178   : > { %2342 = vst [vmem:[%s3285_s22 + $0x11] sm:$0xff] %v1884_v22  ;;  %v1887_v43 = vmax.f32 %v1879_v39, 0.0  ;;  %v1877_v44 = vadd.f32 %v2341_v20, %v1862_v15 }
 0x179   : > { %2346 = vst [vmem:[%s3285_s22 + $0x51] sm:$0xff] %v1888_v42  ;;  %v1891_v45 = vmax.f32 %v1883_v23, 0.0  ;;  %v1881_v49 = vadd.f32 %v2341_v20, %v1866_v24 }
 0x17a   : > { %2345 = vst [vmem:[%s3285_s22 + $0x41] sm:$0xff] %v1887_v43  ;;  %v1885_v60 = vmax.f32 %v1877_v44, 0.0 }
 0x17b   : > { %2349 = vst [vmem:[%s3285_s22 + $0x81] sm:$0xff] %v1891_v45  ;;  %v1889_v25 = vmax.f32 %v1881_v49, 0.0 }
 0x17c   : > { %2343 = vst [vmem:[%s3285_s22 + $0x21] sm:$0xff] %v1885_v60 }
 0x17d   : > { %2347 = vst [vmem:[%s3285_s22 + $0x61] sm:$0xff] %v1889_v25 }
 0x17e PF: > { %s14_s17 = sadd.s32 1, %s2849_s17   ;;  %s3355_s15 = smov %s2845_s16 }
 0x17f   : > { %p11_p5 = scmp.ge.s32.totalorder %s14_s17, 4   ;;  %s3356_s16 = smov %s3358_s18 }
 0x181   :  { %13 = sbr.rel (!%p11_p5) target bundleno = 2 (0x2), region = 89 }

// kernel: res_block_forward.3
= control target key start
LH: loop header
LB: loop body
LE: loop exit
PB: predicated region body
PF: predicated region fallthrough
CT: control target
= control target key end

     0   :  { %s3354_s27 = smov 0   ;;  %s3356_s28 = smov 0   ;;  %s3899_s0 = inlined_call_operand.vmem [shape: f32[2,10,10,128], index: 0, kind: input, shape index: {}]   ;;  %s3900_s1 = inlined_call_operand.vmem [shape: bf16[9,128,128], index: 1, kind: input, shape index: {}]   ;;  %s3901_s2 = inlined_call_operand.vmem [shape: f32[1,128], index: 2, kind: input, shape index: {}]   ;;  %s3902_s3 = inlined_call_operand.vmem [shape: f32[1,128], index: 3, kind: input, shape index: {}]   ;;  %s3903_s4 = inlined_call_operand.vmem [shape: f32[2,4,9,9,128], index: 4, kind: input, shape index: {}]   ;;  %s3904_s5 = inlined_call_operand.vmem [shape: bf16[128,128], index: 5, kind: input, shape index: {}]   ;;  %s3905_s6 = inlined_call_operand.vmem [shape: f32[1,128], index: 6, kind: input, shape index: {}]   ;;  %s3906_s7 = inlined_call_operand.vmem [shape: f32[1,128], index: 7, kind: input, shape index: {}]   ;;  %s3907_s8 = inlined_call_operand.vmem [shape: f32[2,8,8,128], index: 8, kind: output, shape index: {}]  }
   0x1   :  { %s3358_s29 = smov 0  }
   0x2 LB: > { %s30_s30 = sadd.s32 1, %s3303_s28  ;;  %p2464_p0 = scmp.ge.s32.totalorder %s3307_s29, 1  ;;  %s3307_s29 = sphi %s3358_s29, %s18_s29   ;;  %s3303_s28 = sphi %s3356_s28, %s3923_s28   ;;  %s3299_s27 = sphi %s3354_s27, %s3922_s27  }
   0x3   : > { %p32_p1 = scmp.ge.s32.totalorder %s30_s30, 2  ;;  %p337_p2 = scmp.lt.s32.totalorder %s3307_s29, 3 }
   0x5   : > { %s3925_s30 = smov (%p32_p1, %s30_s30), 0  ;;  %p338_p3 = pnand %p2464_p0, %p337_p2 }
   0x7   : > { %341 = sbr.rel (%p338_p3) target bundleno = 391 (0x187), region = 52 }
   0xc   : > { %v3205_v0 = vld [vmem:[%s3900_s1 + $0x78] sm:$0xff]   ;;  %p400_p4 = scmp.lt.s32.totalorder %s3299_s27, 1  ;;  %v3207_v2 = vld [vmem:[%s3900_s1 + $0x70] sm:$0xff]   ;;  %v3209_v4 = vld [vmem:[%s3900_s1 + $0x68] sm:$0xff]  }
   0xd   : > { %v3206_v1 = vld [vmem:[%s3900_s1 + $0x38] sm:$0xff]   ;;  %2940 = vmatprep.subr.bf16.mxu0 %v3205_v0  ;;  %v3208_v3 = vld [vmem:[%s3900_s1 + $0x30] sm:$0xff]   ;;  %v3210_v5 = vld [vmem:[%s3900_s1 + $0x28] sm:$0xff]  }
   0xe   : > { %2964 = vmatprep.subr.bf16.mxu1 %v3206_v1  ;;  %2941 = vmatpush3.bf16.msra.mxu0 %v3205_v0  ;;  %s3927_s27 = smov (!%p400_p4, %s3299_s27), 1  ;;  %v3211_v6 = vld [vmem:[%s3900_s1 + $0x60] sm:$0xff]   ;;  %v3213_v8 = vld [vmem:[%s3900_s1 + $0x58] sm:$0xff]   ;;  %v3215_v10 = vld [vmem:[%s3900_s1 + $0x50] sm:$0xff]  }
   0xf   : > { %2965 = vmatpush3.bf16.msra.mxu1 %v3206_v1  ;;  %2942 = vmatprep.subr.bf16.mxu0 %v3207_v2  ;;  %v3212_v7 = vld [vmem:[%s3900_s1 + $0x20] sm:$0xff]   ;;  %s3180_s25 = smul.u32 160, %s3927_s27  ;;  %v3214_v9 = vld [vmem:[%s3900_s1 + $0x18] sm:$0xff]   ;;  %v3216_v14 = vld [vmem:[%s3900_s1 + $0x10] sm:$0xff]   ;;  %s2779_s12 = sshll.u32 %s3927_s27, 6 }
  0x10   : > { %2966 = vmatprep.subr.bf16.mxu1 %v3208_v3  ;;  %v3217_v18 = vld [vmem:[%s3900_s1 + $0x48] sm:$0xff]   ;;  %v3219_v20 = vld [vmem:[%s3900_s1 + $0x40] sm:$0xff]   ;;  %v3221_v26 = vld [vmem:[%s3900_s1 + $0xb8] sm:$0xff]   ;;  %s2466_s9 = smul.u32 576, %s3927_s27  ;;  %s3856_s15 = scalar_lea.vmem %s3907_s8, %s2779_s12 }
  0x11   : > { %s3408_s14 = scalar_lea.vmem %s3899_s0, %s3180_s25  ;;  %v3218_v19 = vld [vmem:[%s3900_s1 + $0x8] sm:$0xff]   ;;  %v3220_v21 = vld [vmem:[%s3900_s1] sm:$0xff]   ;;  %v3222_v27 = vld [vmem:[%s3900_s1 + $0xf8] sm:$0xff]  }
  0x12   : > { %2943 = vmatpush3.bf16.msra.mxu0 %v3207_v2  ;;  %v472_v11 = vld [vmem:[%s3408_s14 + $0x1] sm:$0xff]  ;;  %v3415_v12 = vld [vmem:[%s3408_s14 + $0x11] sm:$0xff]  ;;  %s3736_s17 = scalar_lea.vmem %s3903_s4, %s2466_s9 }
  0x13   : > { %2967 = vmatpush3.bf16.msra.mxu1 %v3208_v3  ;;  %2944 = vmatprep.subr.bf16.mxu0 %v3209_v4  ;;  %v440_v13 = vld [vmem:[%s3408_s14] sm:$0xff]  ;;  %v2780_v15 = vpack.c.bf16 %v3415_v12, %v472_v11  ;;  %v3423_v16 = vld [vmem:[%s3408_s14 + $0x10] sm:$0xff]  ;;  %v3225_v38 = vld [vmem:[%s3900_s1 + $0xa8] sm:$0xff]  }
  0x14   : > { %2968 = vmatprep.subr.bf16.mxu1 %v3210_v5  ;;  %v2784_v17 = vpack.c.bf16 %v3423_v16, %v440_v13  ;;  %v3439_v22 = vld [vmem:[%s3408_s14 + $0x21] sm:$0xff]  ;;  %v3442_v23 = vld [vmem:[%s3408_s14 + $0x31] sm:$0xff] }
  0x15   : > { %2956 = vmatprep.mubr.bf16.mxu0 %v2780_v15  ;;  %v442_v24 = vld [vmem:[%s3408_s14 + $0x20] sm:$0xff]  ;;  %v3446_v25 = vld [vmem:[%s3408_s14 + $0x30] sm:$0xff]  ;;  %v3456_v28 = vpack.c.bf16 %v3442_v23, %v3439_v22  ;;  %v3226_v43 = vld [vmem:[%s3900_s1 + $0xe8] sm:$0xff]  }
  0x16   : > { %2945 = vmatpush3.bf16.msra.mxu0 %v3209_v4  ;;  %2980 = vmatprep.mubr.bf16.mxu1 %v2784_v17  ;;  %v3223_v29 = vld [vmem:[%s3900_s1 + $0xb0] sm:$0xff]   ;;  %v3462_v30 = vld [vmem:[%s3408_s14 + $0x41] sm:$0xff]  ;;  %v3471_v33 = vpack.c.bf16 %v3446_v25, %v442_v24  ;;  %v2792_v51 = vpack.c.bf16 %v442_v24, %v3423_v16  ;;  %v3229_v52 = vld [vmem:[%s3900_s1 + $0x98] sm:$0xff]  }
  0x17   : > { %2969 = vmatpush3.bf16.msra.mxu1 %v3210_v5  ;;  %2946 = vmatprep.subr.bf16.mxu0 %v3211_v6  ;;  %v3465_v31 = vld [vmem:[%s3408_s14 + $0x51] sm:$0xff]  ;;  %v3468_v32 = vld [vmem:[%s3408_s14 + $0x40] sm:$0xff]  ;;  %v3233_v56 = vld [vmem:[%s3900_s1 + $0x88] sm:$0xff]  }
  0x18   : > { %2970 = vmatprep.subr.bf16.mxu1 %v3212_v7  ;;  %v3474_v34 = vld [vmem:[%s3408_s14 + $0x50] sm:$0xff]  ;;  %v3481_v36 = vpack.c.bf16 %v3465_v31, %v3462_v30  ;;  %v3484_v37 = vld [vmem:[%s3408_s14 + $0x61] sm:$0xff]  ;;  %v3230_v53 = vld [vmem:[%s3900_s1 + $0xd8] sm:$0xff]   ;;  %v2793_v3 = vpack.c.bf16 %v3468_v32, %v3446_v25 }
  0x19   : > { %v3224_v35 = vld [vmem:[%s3900_s1 + $0xf0] sm:$0xff]   ;;  %v3492_v39 = vpack.c.bf16 %v3474_v34, %v3468_v32  ;;  %v3499_v41 = vld [vmem:[%s3408_s14 + $0x60] sm:$0xff]  ;;  %v3234_v57 = vld [vmem:[%s3900_s1 + $0xc8] sm:$0xff]  }
  0x1a   : > { %2947 = vmatpush3.bf16.msra.mxu0 %v3211_v6  ;;  %v3495_v40 = vld [vmem:[%s3408_s14 + $0x71] sm:$0xff]  ;;  %v779_v45 = vld [vmem:[%s3408_s14 + $0x2] sm:$0xff] }
  0x1b   : > { %2971 = vmatpush3.bf16.msra.mxu1 %v3212_v7  ;;  %2948 = vmatprep.subr.bf16.mxu0 %v3213_v8  ;;  %v3502_v42 = vld [vmem:[%s3408_s14 + $0x70] sm:$0xff]  ;;  %v3511_v44 = vpack.c.bf16 %v3495_v40, %v3484_v37  ;;  %v3227_v48 = vld [vmem:[%s3900_s1 + $0xa0] sm:$0xff]   ;;  %v3237_v62 = vld [vmem:[%s3900_s1 + $0x138] sm:$0xff]  }
  0x1c   : > { %2972 = vmatprep.subr.bf16.mxu1 %v3214_v9  ;;  %v3515_v46 = vld [vmem:[%s3408_s14 + $0x12] sm:$0xff]  ;;  %v3519_v47 = vpack.c.bf16 %v3502_v42, %v3499_v41  ;;  %v3228_v49 = vld [vmem:[%s3900_s1 + $0xe0] sm:$0xff]   ;;  %v3242_v13 = vld [vmem:[%s3900_s1 + $0x168] sm:$0xff]  }
  0x1d   : > { %v2788_v50 = vpack.c.bf16 %v3515_v46, %v779_v45  ;;  %v3231_v54 = vld [vmem:[%s3900_s1 + $0x90] sm:$0xff]   ;;  %v3235_v58 = vld [vmem:[%s3900_s1 + $0x80] sm:$0xff]   ;;  %v3238_v63 = vld [vmem:[%s3900_s1 + $0x178] sm:$0xff]  }
  0x1e   : > { %2949 = vmatpush3.bf16.msra.mxu0 %v3213_v8  ;;  %v3232_v55 = vld [vmem:[%s3900_s1 + $0xd0] sm:$0xff]   ;;  %v3236_v59 = vld [vmem:[%s3900_s1 + $0xc0] sm:$0xff]   ;;  %v3249_v24 = vld [vmem:[%s3900_s1 + $0x108] sm:$0xff]  }
  0x1f   : > { %2973 = vmatpush3.bf16.msra.mxu1 %v3214_v9  ;;  %2950 = vmatprep.subr.bf16.mxu0 %v3215_v10  ;;  %v781_v60 = vld [vmem:[%s3408_s14 + $0x22] sm:$0xff]  ;;  %v3557_v61 = vld [vmem:[%s3408_s14 + $0x32] sm:$0xff]  ;;  %v2794_v9 = vpack.c.bf16 %v3499_v41, %v3474_v34  ;;  %v2797_v34 = vpack.c.bf16 %v3462_v30, %v3442_v23 }
  0x20   : > { %2974 = vmatprep.subr.bf16.mxu1 %v3216_v14  ;;  %v3566_v0 = vpack.c.bf16 %v3557_v61, %v781_v60  ;;  %v3569_v1 = vld [vmem:[%s3408_s14 + $0x42] sm:$0xff]  ;;  %v3572_v2 = vld [vmem:[%s3408_s14 + $0x52] sm:$0xff] }
  0x21   : > { %v3239_v4 = vld [vmem:[%s3900_s1 + $0x130] sm:$0xff]   ;;  %v3584_v6 = vpack.c.bf16 %v3572_v2, %v3569_v1  ;;  %v3587_v7 = vld [vmem:[%s3408_s14 + $0x62] sm:$0xff]  ;;  %v3254_v32 = vld [vmem:[%s3900_s1 + $0x1f8] sm:$0xff]  }
  0x22   : > { %2951 = vmatpush3.bf16.msra.mxu0 %v3215_v10  ;;  %v3240_v5 = vld [vmem:[%s3900_s1 + $0x170] sm:$0xff]   ;;  %v3241_v10 = vld [vmem:[%s3900_s1 + $0x128] sm:$0xff]   ;;  %v3599_v11 = vld [vmem:[%s3408_s14 + $0x80] sm:$0xff]  ;;  %v2802_v23 = vpack.c.bf16 %v3587_v7, %v3572_v2 }
  0x23   : > { %2975 = vmatpush3.bf16.msra.mxu1 %v3216_v14  ;;  %2952 = vmatprep.subr.bf16.mxu0 %v3217_v18  ;;  %v3591_v8 = vld [vmem:[%s3408_s14 + $0x72] sm:$0xff]  ;;  %v2795_v15 = vpack.c.bf16 %v3599_v11, %v3502_v42  ;;  %v3243_v16 = vld [vmem:[%s3900_s1 + $0x120] sm:$0xff]   ;;  %v3250_v25 = vld [vmem:[%s3900_s1 + $0x148] sm:$0xff]   ;;  %v2798_v42 = vpack.c.bf16 %v3484_v37, %v3465_v31 }
  0x24   : > { %2976 = vmatprep.subr.bf16.mxu1 %v3218_v19  ;;  %v3607_v14 = vpack.c.bf16 %v3591_v8, %v3587_v7  ;;  %v3244_v17 = vld [vmem:[%s3900_s1 + $0x160] sm:$0xff]   ;;  %v3256_v41 = vld [vmem:[%s3900_s1 + $0x1f0] sm:$0xff]   ;;  %v3258_v31 = vld [vmem:[%s3900_s1 + $0x1e8] sm:$0xff]  }
  0x25   : > { %v3666_v30 = vld [vmem:[%s3408_s14 + $0x81] sm:$0xff]  ;;  %v3280_v7 = vld [vmem:[%s3904_s5 + $0x10] sm:$0xff]  }
  0x26   : > { %2953 = vmatpush3.bf16.msra.mxu0 %v3217_v18  ;;  %v2796_v18 = vpack.c.bf16 %v3439_v22, %v3415_v12  ;;  %v3247_v12 = vld [vmem:[%s3900_s1 + $0x110] sm:$0xff]   ;;  %v3672_v45 = vld [vmem:[%s3408_s14 + $0x82] sm:$0xff]  ;;  %v2799_v37 = vpack.c.bf16 %v3666_v30, %v3495_v40  ;;  %v3261_v40 = vld [vmem:[%s3900_s1 + $0x198] sm:$0xff]  }
  0x27   : > { %2977 = vmatpush3.bf16.msra.mxu1 %v3218_v19  ;;  %2954 = vmatprep.subr.bf16.mxu0 %v3219_v20  ;;  %v2800_v19 = vpack.c.bf16 %v781_v60, %v3515_v46  ;;  %v3248_v22 = vld [vmem:[%s3900_s1 + $0x150] sm:$0xff]   ;;  %v2803_v46 = vpack.c.bf16 %v3672_v45, %v3591_v8  ;;  %v3273_v60 = vld [vmem:[%s3900_s1 + $0x228] sm:$0xff]   ;;  %v3275_v2 = vld [vmem:[%s3900_s1 + $0x220] sm:$0xff]  }
  0x28   : > { %2978 = vmatprep.subr.bf16.mxu1 %v3220_v21  ;;  %v3282_v8 = vld [vmem:[%s3904_s5 + $0x8] sm:$0xff]  }
  0x2a   : > { %2955 = vmatpush3.bf16.msra.mxu0 %v3219_v20  ;;  %v3245_v20 = vld [vmem:[%s3900_s1 + $0x118] sm:$0xff]  }
  0x2b   : > { %2979 = vmatpush3.bf16.msra.mxu1 %v3220_v21  ;;  %2988 = vmatprep.subr.bf16.mxu0 %v3221_v26  ;;  %v3246_v21 = vld [vmem:[%s3900_s1 + $0x158] sm:$0xff]  }
  0x2c   : > { %3012 = vmatprep.subr.bf16.mxu1 %v3222_v27 }
  0x2d   : > { %2957 = vmatmul.mubr.bf16.vlgmr.msra.gmra.mxu0 %v3456_v28 }
  0x2e   : > { %2981 = vmatmul.mubr.bf16.vlgmr.msra.gmra.mxu1 %v3471_v33  ;;  %2989 = vmatpush3.bf16.msra.mxu0 %v3221_v26  ;;  %v3251_v26 = vld [vmem:[%s3900_s1 + $0x100] sm:$0xff]  }
  0x2f   : > { %3013 = vmatpush3.bf16.msra.mxu1 %v3222_v27  ;;  %2990 = vmatprep.subr.bf16.mxu0 %v3223_v29  ;;  %v3252_v27 = vld [vmem:[%s3900_s1 + $0x140] sm:$0xff]  }
  0x30   : > { %3014 = vmatprep.subr.bf16.mxu1 %v3224_v35  ;;  %2960 = vmatprep.mubr.bf16.mxu0 %v3481_v36 }
  0x31   : > { %2984 = vmatprep.mubr.bf16.mxu1 %v3492_v39 }
  0x32   : > { %2991 = vmatpush3.bf16.msra.mxu0 %v3223_v29  ;;  %v3253_v29 = vld [vmem:[%s3900_s1 + $0x1b8] sm:$0xff]  }
  0x33   : > { %3015 = vmatpush3.bf16.msra.mxu1 %v3224_v35  ;;  %2992 = vmatprep.subr.bf16.mxu0 %v3225_v38  ;;  %v2801_v35 = vpack.c.bf16 %v3569_v1, %v3557_v61  ;;  %v2688_v61 = vld [vmem:[%s3408_s14 + $0x91] sm:$0xff]  ;;  %v2756_v1 = vld [vmem:[%s3736_s17 + $0x1c0] sm:$0xff] }
  0x34   : > { %3016 = vmatprep.subr.bf16.mxu1 %v3226_v43 }
  0x35   : > { %2961 = vmatmul.mubr.bf16.gmra.mxu0 %v3511_v44 }
  0x36   : > { %2993 = vmatpush3.bf16.msra.mxu0 %v3225_v38  ;;  %2985 = vmatmul.mubr.bf16.gmra.mxu1 %v3519_v47  ;;  %v3255_v38 = vld [vmem:[%s3900_s1 + $0x1b0] sm:$0xff]  }
  0x37   : > { %3017 = vmatpush3.bf16.msra.mxu1 %v3226_v43  ;;  %2994 = vmatprep.subr.bf16.mxu0 %v3227_v48  ;;  %v3257_v43 = vld [vmem:[%s3900_s1 + $0x1a8] sm:$0xff]  }
  0x38   : > { %3018 = vmatprep.subr.bf16.mxu1 %v3228_v49  ;;  %3004 = vmatprep.mubr.bf16.mxu0 %v2788_v50  ;;  %v3262_v50 = vld [vmem:[%s3900_s1 + $0x1d8] sm:$0xff]  }
  0x39   : > { %3028 = vmatprep.mubr.bf16.mxu1 %v2792_v51  ;;  %v3263_v51 = vld [vmem:[%s3900_s1 + $0x190] sm:$0xff]  }
  0x3a   : > { %2995 = vmatpush3.bf16.msra.mxu0 %v3227_v48  ;;  %v3259_v48 = vld [vmem:[%s3900_s1 + $0x1a0] sm:$0xff]  }
  0x3b   : > { %3019 = vmatpush3.bf16.msra.mxu1 %v3228_v49  ;;  %2996 = vmatprep.subr.bf16.mxu0 %v3229_v52  ;;  %v3260_v49 = vld [vmem:[%s3900_s1 + $0x1e0] sm:$0xff]  }
  0x3c   : > { %3020 = vmatprep.subr.bf16.mxu1 %v3230_v53 }
  0x3e   : > { %2997 = vmatpush3.bf16.msra.mxu0 %v3229_v52  ;;  %v3264_v52 = vld [vmem:[%s3900_s1 + $0x1d0] sm:$0xff]  }
  0x3f   : > { %3021 = vmatpush3.bf16.msra.mxu1 %v3230_v53  ;;  %2998 = vmatprep.subr.bf16.mxu0 %v3231_v54  ;;  %v3267_v53 = vld [vmem:[%s3900_s1 + $0x180] sm:$0xff]  }
  0x40   : > { %3022 = vmatprep.subr.bf16.mxu1 %v3232_v55 }
  0x42   : > { %2999 = vmatpush3.bf16.msra.mxu0 %v3231_v54  ;;  %v3268_v54 = vld [vmem:[%s3900_s1 + $0x1c0] sm:$0xff]  }
  0x43   : > { %3023 = vmatpush3.bf16.msra.mxu1 %v3232_v55  ;;  %3000 = vmatprep.subr.bf16.mxu0 %v3233_v56  ;;  %v3269_v55 = vld [vmem:[%s3900_s1 + $0x238] sm:$0xff]  }
  0x44   : > { %3024 = vmatprep.subr.bf16.mxu1 %v3234_v57 }
  0x46   : > { %3001 = vmatpush3.bf16.msra.mxu0 %v3233_v56  ;;  %v3270_v56 = vld [vmem:[%s3904_s5 + $0x38] sm:$0xff]  }
  0x47   : > { %3025 = vmatpush3.bf16.msra.mxu1 %v3234_v57  ;;  %3002 = vmatprep.subr.bf16.mxu0 %v3235_v58  ;;  %v3271_v57 = vld [vmem:[%s3900_s1 + $0x230] sm:$0xff]  }
  0x48   : > { %3026 = vmatprep.subr.bf16.mxu1 %v3236_v59 }
  0x4a   : > { %3003 = vmatpush3.bf16.msra.mxu0 %v3235_v58  ;;  %v3272_v58 = vld [vmem:[%s3904_s5 + $0x30] sm:$0xff]  }
  0x4b   : > { %3027 = vmatpush3.bf16.msra.mxu1 %v3236_v59  ;;  %3036 = vmatprep.subr.bf16.mxu0 %v3237_v62  ;;  %v2652_v59 = vld [vmem:[%s3408_s14 + $0x90] sm:$0xff] }
  0x4c   : > { %3060 = vmatprep.subr.bf16.mxu1 %v3238_v63 }
  0x4d   : > { %3005 = vmatmul.mubr.bf16.vlgmr.msra.gmra.mxu0 %v3566_v0 }
  0x4e   : > { %3029 = vmatmul.mubr.bf16.vlgmr.msra.gmra.mxu1 %v2793_v3  ;;  %3037 = vmatpush3.bf16.msra.mxu0 %v3237_v62  ;;  %v2811_v62 = vpack.c.bf16 %v2688_v61, %v3666_v30 }
  0x4f   : > { %3061 = vmatpush3.bf16.msra.mxu1 %v3238_v63  ;;  %3038 = vmatprep.subr.bf16.mxu0 %v3239_v4  ;;  %v2755_v63 = vld [vmem:[%s3736_s17 + $0x1b0] sm:$0xff] }
  0x50   : > { %3062 = vmatprep.subr.bf16.mxu1 %v3240_v5  ;;  %3008 = vmatprep.mubr.bf16.mxu0 %v3584_v6  ;;  %v2816_v3 = vpack.c.bf16 %v2756_v1, %v2755_v63 }
  0x51   : > { %3032 = vmatprep.mubr.bf16.mxu1 %v2794_v9  ;;  %v3283_v9 = vld [vmem:[%s3900_s1 + $0x200] sm:$0xff]  }
  0x52   : > { %3039 = vmatpush3.bf16.msra.mxu0 %v3239_v4  ;;  %v3278_v4 = vld [vmem:[%s3904_s5 + $0x18] sm:$0xff]  }
  0x53   : > { %3063 = vmatpush3.bf16.msra.mxu1 %v3240_v5  ;;  %3040 = vmatprep.subr.bf16.mxu0 %v3241_v10  ;;  %v3279_v5 = vld [vmem:[%s3900_s1 + $0x210] sm:$0xff]  }
  0x54   : > { %3064 = vmatprep.subr.bf16.mxu1 %v3242_v13 }
  0x55   : > { %3009 = vmatmul.mubr.bf16.gmra.mxu0 %v3607_v14 }
  0x56   : > { %3041 = vmatpush3.bf16.msra.mxu0 %v3241_v10  ;;  %3033 = vmatmul.mubr.bf16.gmra.mxu1 %v2795_v15  ;;  %v3284_v10 = vld [vmem:[%s3904_s5] sm:$0xff]   ;;  %v2759_v15 = vld [vmem:[%s3736_s17 + $0x1f0] sm:$0xff] }
  0x57   : > { %3065 = vmatpush3.bf16.msra.mxu1 %v3242_v13  ;;  %3042 = vmatprep.subr.bf16.mxu0 %v3243_v16  ;;  %v2758_v13 = vld [vmem:[%s3736_s17 + $0x1e0] sm:$0xff] }
  0x58   : > { %3066 = vmatprep.subr.bf16.mxu1 %v3244_v17  ;;  %3052 = vmatprep.mubr.bf16.mxu0 %v2796_v18 }
  0x59   : > { %3076 = vmatprep.mubr.bf16.mxu1 %v2800_v19  ;;  %v2724_v19 = vld [vmem:[%s3408_s14 + $0x92] sm:$0xff] }
  0x5a   : > { %3043 = vmatpush3.bf16.msra.mxu0 %v3243_v16  ;;  %v2760_v16 = vld [vmem:[%s3736_s17 + $0x200] sm:$0xff] }
  0x5b   : > { %3067 = vmatpush3.bf16.msra.mxu1 %v3244_v17  ;;  %3044 = vmatprep.subr.bf16.mxu0 %v3245_v20  ;;  %v2818_v18 = vpack.c.bf16 %v2760_v16, %v2759_v15 }
  0x5c   : > { %3068 = vmatprep.subr.bf16.mxu1 %v3246_v21 }
  0x5e   : > { %3045 = vmatpush3.bf16.msra.mxu0 %v3245_v20  ;;  %v2761_v20 = vld [vmem:[%s3736_s17 + $0x210] sm:$0xff] }
  0x5f   : > { %3069 = vmatpush3.bf16.msra.mxu1 %v3246_v21  ;;  %3046 = vmatprep.subr.bf16.mxu0 %v3247_v12  ;;  %v2762_v21 = vld [vmem:[%s3736_s17 + $0x220] sm:$0xff] }
  0x60   : > { %3070 = vmatprep.subr.bf16.mxu1 %v3248_v22 }
  0x62   : > { %3047 = vmatpush3.bf16.msra.mxu0 %v3247_v12  ;;  %v2815_v12 = vpack.c.bf16 %v2724_v19, %v3672_v45 }
  0x63   : > { %3071 = vmatpush3.bf16.msra.mxu1 %v3248_v22  ;;  %3048 = vmatprep.subr.bf16.mxu0 %v3249_v24  ;;  %v2819_v22 = vpack.c.bf16 %v2762_v21, %v2761_v20 }
  0x64   : > { %3072 = vmatprep.subr.bf16.mxu1 %v3250_v25 }
  0x66   : > { %3049 = vmatpush3.bf16.msra.mxu0 %v3249_v24 }
  0x67   : > { %3073 = vmatpush3.bf16.msra.mxu1 %v3250_v25  ;;  %3050 = vmatprep.subr.bf16.mxu0 %v3251_v26 }
  0x68   : > { %3074 = vmatprep.subr.bf16.mxu1 %v3252_v27 }
  0x6a   : > { %3051 = vmatpush3.bf16.msra.mxu0 %v3251_v26 }
  0x6b   : > { %3075 = vmatpush3.bf16.msra.mxu1 %v3252_v27  ;;  %3084 = vmatprep.subr.bf16.mxu0 %v3253_v29 }
  0x6c   : > { %3108 = vmatprep.subr.bf16.mxu1 %v3254_v32 }
  0x6d   : > { %3053 = vmatmul.mubr.bf16.vlgmr.msra.gmra.mxu0 %v2797_v34 }
  0x6e   : > { %3077 = vmatmul.mubr.bf16.vlgmr.msra.gmra.mxu1 %v2801_v35  ;;  %3085 = vmatpush3.bf16.msra.mxu0 %v3253_v29 }
  0x6f   : > { %3109 = vmatpush3.bf16.msra.mxu1 %v3254_v32  ;;  %3086 = vmatprep.subr.bf16.mxu0 %v3255_v38 }
  0x70   : > { %3110 = vmatprep.subr.bf16.mxu1 %v3256_v41  ;;  %3056 = vmatprep.mubr.bf16.mxu0 %v2798_v42 }
  0x71   : > { %3080 = vmatprep.mubr.bf16.mxu1 %v2802_v23 }
  0x72   : > { %3087 = vmatpush3.bf16.msra.mxu0 %v3255_v38 }
  0x73   : > { %3111 = vmatpush3.bf16.msra.mxu1 %v3256_v41  ;;  %3088 = vmatprep.subr.bf16.mxu0 %v3257_v43 }
  0x74   : > { %3112 = vmatprep.subr.bf16.mxu1 %v3258_v31 }
  0x75   : > { %3057 = vmatmul.mubr.bf16.gmra.mxu0 %v2799_v37 }
  0x76   : > { %3089 = vmatpush3.bf16.msra.mxu0 %v3257_v43  ;;  %3081 = vmatmul.mubr.bf16.gmra.mxu1 %v2803_v46 }
  0x77   : > { %3113 = vmatpush3.bf16.msra.mxu1 %v3258_v31  ;;  %3090 = vmatprep.subr.bf16.mxu0 %v3259_v48 }
  0x78   : > { %3114 = vmatprep.subr.bf16.mxu1 %v3260_v49  ;;  %3100 = vmatprep.mubr.bf16.mxu0 %v3471_v33  ;;  %v3265_v33 = vld [vmem:[%s3900_s1 + $0x188] sm:$0xff]  }
  0x79   : > { %3124 = vmatprep.mubr.bf16.mxu1 %v3456_v28  ;;  %v3266_v28 = vld [vmem:[%s3900_s1 + $0x1c8] sm:$0xff]  }
  0x7a   : > { %3091 = vmatpush3.bf16.msra.mxu0 %v3259_v48 }
  0x7b   : > { %3115 = vmatpush3.bf16.msra.mxu1 %v3260_v49  ;;  %3092 = vmatprep.subr.bf16.mxu0 %v3261_v40 }
  0x7c   : > { %3116 = vmatprep.subr.bf16.mxu1 %v3262_v50 }
  0x7e   : > { %3093 = vmatpush3.bf16.msra.mxu0 %v3261_v40 }
  0x7f   : > { %3117 = vmatpush3.bf16.msra.mxu1 %v3262_v50  ;;  %3094 = vmatprep.subr.bf16.mxu0 %v3263_v51 }
  0x80   : > { %3118 = vmatprep.subr.bf16.mxu1 %v3264_v52 }
  0x82   : > { %3095 = vmatpush3.bf16.msra.mxu0 %v3263_v51 }
  0x83   : > { %3119 = vmatpush3.bf16.msra.mxu1 %v3264_v52  ;;  %3096 = vmatprep.subr.bf16.mxu0 %v3265_v33 }
  0x84   : > { %3120 = vmatprep.subr.bf16.mxu1 %v3266_v28 }
  0x86   : > { %3097 = vmatpush3.bf16.msra.mxu0 %v3265_v33 }
  0x87   : > { %3121 = vmatpush3.bf16.msra.mxu1 %v3266_v28  ;;  %3098 = vmatprep.subr.bf16.mxu0 %v3267_v53 }
  0x88   : > { %3122 = vmatprep.subr.bf16.mxu1 %v3268_v54 }
  0x8a   : > { %3099 = vmatpush3.bf16.msra.mxu0 %v3267_v53 }
  0x8b   : > { %3123 = vmatpush3.bf16.msra.mxu1 %v3268_v54  ;;  %3132 = vmatprep.subr.bf16.mxu0 %v3269_v55 }
  0x8c   : > { %3156 = vmatprep.subr.bf16.mxu1 %v3270_v56 }
  0x8d   : > { %3101 = vmatmul.mubr.bf16.vlgmr.msra.gmra.mxu0 %v3492_v39  ;;  %v2807_v39 = vpack.c.bf16 %v2652_v59, %v3599_v11  ;;  %v2757_v11 = vld [vmem:[%s3736_s17 + $0x1d0] sm:$0xff] }
  0x8e   : > { %3125 = vmatmul.mubr.bf16.vlgmr.msra.gmra.mxu1 %v3481_v36  ;;  %3133 = vmatpush3.bf16.msra.mxu0 %v3269_v55  ;;  %v3274_v36 = vld [vmem:[%s3904_s5 + $0x28] sm:$0xff]   ;;  %v2817_v17 = vpack.c.bf16 %v2758_v13, %v2757_v11 }
  0x8f   : > { %3157 = vmatpush3.bf16.msra.mxu1 %v3270_v56  ;;  %3134 = vmatprep.subr.bf16.mxu0 %v3271_v57 }
  0x90   : > { %3158 = vmatprep.subr.bf16.mxu1 %v3272_v58  ;;  %3104 = vmatprep.mubr.bf16.mxu0 %v3519_v47  ;;  %v3276_v47 = vld [vmem:[%s3904_s5 + $0x20] sm:$0xff]  }
  0x91   : > { %3128 = vmatprep.mubr.bf16.mxu1 %v3511_v44  ;;  %v3277_v44 = vld [vmem:[%s3900_s1 + $0x218] sm:$0xff]  }
  0x92   : > { %3135 = vmatpush3.bf16.msra.mxu0 %v3271_v57 }
  0x93   : > { %3159 = vmatpush3.bf16.msra.mxu1 %v3272_v58  ;;  %3136 = vmatprep.subr.bf16.mxu0 %v3273_v60 }
  0x94   : > { %3160 = vmatprep.subr.bf16.mxu1 %v3274_v36 }
  0x95   : > { %3105 = vmatmul.mubr.bf16.gmra.mxu0 %v2807_v39 }
  0x96   : > { %3137 = vmatpush3.bf16.msra.mxu0 %v3273_v60  ;;  %3129 = vmatmul.mubr.bf16.gmra.mxu1 %v2811_v62 }
  0x97   : > { %3161 = vmatpush3.bf16.msra.mxu1 %v3274_v36  ;;  %3138 = vmatprep.subr.bf16.mxu0 %v3275_v2 }
  0x98   : > { %3162 = vmatprep.subr.bf16.mxu1 %v3276_v47  ;;  %3148 = vmatprep.mubr.bf16.mxu0 %v3566_v0  ;;  %v3281_v0 = vld [vmem:[%s3900_s1 + $0x208] sm:$0xff]  }
  0x99   : > { %3172 = vmatprep.mubr.bf16.mxu1 %v2816_v3 }
  0x9a   : > { %3139 = vmatpush3.bf16.msra.mxu0 %v3275_v2 }
  0x9b   : > { %3163 = vmatpush3.bf16.msra.mxu1 %v3276_v47  ;;  %3140 = vmatprep.subr.bf16.mxu0 %v3277_v44 }
  0x9c   : > { %3164 = vmatprep.subr.bf16.mxu1 %v3278_v4 }
  0x9e   : > { %3141 = vmatpush3.bf16.msra.mxu0 %v3277_v44 }
  0x9f   : > { %3165 = vmatpush3.bf16.msra.mxu1 %v3278_v4  ;;  %3142 = vmatprep.subr.bf16.mxu0 %v3279_v5 }
  0xa0   : > { %3166 = vmatprep.subr.bf16.mxu1 %v3280_v7 }
  0xa2   : > { %3143 = vmatpush3.bf16.msra.mxu0 %v3279_v5 }
  0xa3   : > { %3167 = vmatpush3.bf16.msra.mxu1 %v3280_v7  ;;  %3144 = vmatprep.subr.bf16.mxu0 %v3281_v0 }
  0xa4   : > { %3168 = vmatprep.subr.bf16.mxu1 %v3282_v8 }
  0xa6   : > { %3145 = vmatpush3.bf16.msra.mxu0 %v3281_v0 }
  0xa7   : > { %3169 = vmatpush3.bf16.msra.mxu1 %v3282_v8  ;;  %3146 = vmatprep.subr.bf16.mxu0 %v3283_v9 }
  0xa8   : > { %3170 = vmatprep.subr.bf16.mxu1 %v3284_v10 }
  0xaa   : > { %3147 = vmatpush3.bf16.msra.mxu0 %v3283_v9 }
  0xab   : > { %3171 = vmatpush3.bf16.msra.mxu1 %v3284_v10 }
  0xad   : > { %3149 = vmatmul.mubr.bf16.vlgmr.msra.gmra.mxu0 %v3584_v6 }
  0xae   : > { %3173 = vmatmul.mubr.bf16.vlgmr.msra.gmra.mxu1 %v2817_v17  ;;  %3152 = vmatprep.mubr.bf16.mxu0 %v3607_v14 }
  0xaf   : > { %3176 = vmatprep.mubr.bf16.mxu1 %v2818_v18 }
  0xb5   : > { %3153 = vmatmul.mubr.bf16.gmra.mxu0 %v2815_v12 }
  0xb6   : > { %3177 = vmatmul.mubr.bf16.gmra.mxu1 %v2819_v22 }
  0xed   : > { %v2958_v24 = vpop.f32.mrf.mxu0 }
  0xee   : > { %v2982_v26 = vpop.f32.mrf.mxu1 }
  0xef   : > { %v611_v25 = vpop.f32.mrf.mxu0  ;;  %v757_v11 = vadd.f32 %v2982_v26, %v2958_v24 }
  0xf0   : > { %v748_v29 = vpop.f32.mrf.mxu1 }
  0xf1   : > { %v2959_v27 = vpop.f32.mrf.mxu0  ;;  %v749_v16 = vadd.f32 %v748_v29, %v611_v25 }
  0xf2   : > { %v2983_v6 = vpop.f32.mrf.mxu1 }
  0xf3   : > { %v614_v32 = vpop.f32.mrf.mxu0  ;;  %v760_v18 = vadd.f32 %v2983_v6, %v2959_v27 }
  0xf4   : > { %v751_v38 = vpop.f32.mrf.mxu1 }
  0xf5   : > { %v2962_v34 = vpop.f32.mrf.mxu0  ;;  %v752_v12 = vadd.f32 %v751_v38, %v614_v32 }
  0xf6   : > { %v2986_v14 = vpop.f32.mrf.mxu1 }
  0xf7   : > { %v627_v35 = vpop.f32.mrf.mxu0 }
  0xf8   : > { %v764_v42 = vpop.f32.mrf.mxu1 }
  0xf9   : > { %v2963_v41 = vpop.f32.mrf.mxu0  ;;  %v765_v24 = vadd.f32 %v764_v42, %v627_v35 }
  0xfa   : > { %v2987_v43 = vpop.f32.mrf.mxu1 }
  0xfb   : > { %v3788_v23 = vpop.f32.mrf.mxu0  ;;  %v776_v25 = vadd.f32 %v2987_v43, %v2963_v41 }
  0xfc   : > { %3908 = vst [vmem:[#allocation2_spill] sm:$0xff] %v3788_v23  ;;  %v767_v31 = vpop.f32.mrf.mxu1 }
 0x103   : > { %v3915_v6 = vld [vmem:[#allocation2_spill] sm:$0xff] }
 0x10d   : > { %v3006_v30 = vpop.f32.mrf.mxu0 }
 0x10e   : > { %v3030_v37 = vpop.f32.mrf.mxu1  ;;  %v951_v17 = vadd.f32 %v3006_v30, %v757_v11 }
 0x10f   : > { %v918_v45 = vpop.f32.mrf.mxu0 }
 0x110   : > { %v1097_v48 = vpop.f32.mrf.mxu1  ;;  %v949_v19 = vadd.f32 %v918_v45, %v749_v16  ;;  %v1130_v22 = vadd.f32 %v3030_v37, %v951_v17  ;;  %v768_v45 = vadd.f32 %v767_v31, %v3915_v6 }
 0x111   : > { %v3007_v46 = vpop.f32.mrf.mxu0 }
 0x112   : > { %v3031_v40 = vpop.f32.mrf.mxu1 }
 0x113   : > { %v921_v49 = vpop.f32.mrf.mxu0 }
 0x114   : > { %v1100_v51 = vpop.f32.mrf.mxu1 }
 0x115   : > { %v3010_v50 = vpop.f32.mrf.mxu0 }
 0x116   : > { %v3034_v33 = vpop.f32.mrf.mxu1 }
 0x117   : > { %v934_v52 = vpop.f32.mrf.mxu0 }
 0x118   : > { %v1113_v53 = vpop.f32.mrf.mxu1  ;;  %v953_v11 = vadd.f32 %v934_v52, %v765_v24 }
 0x119   : > { %v3011_v28 = vpop.f32.mrf.mxu0 }
 0x11a   : > { %v3035_v55 = vpop.f32.mrf.mxu1  ;;  %v956_v38 = vadd.f32 %v3011_v28, %v776_v25  ;;  %v1132_v41 = vadd.f32 %v1113_v53, %v953_v11 }
 0x11b   : > { %v937_v54 = vpop.f32.mrf.mxu0 }
 0x11c   : > { %v3790_v57 = vpop.f32.mrf.mxu1 }
 0x11d   : > { %3909 = vst [vmem:[#allocation3_spill] sm:$0xff] %v3790_v57  ;;  %v950_v57 = vadd.f32 %v921_v49, %v752_v12 }
 0x11f   : > { %v1129_v32 = vadd.f32 %v1100_v51, %v950_v57 }
 0x12d   : > { %v3054_v56 = vpop.f32.mrf.mxu0 }
 0x12e   : > { %v3078_v59 = vpop.f32.mrf.mxu1  ;;  %v1308_v23 = vadd.f32 %v3054_v56, %v1130_v22 }
 0x12f   : > { %v1275_v58 = vpop.f32.mrf.mxu0 }
 0x130   : > { %v1453_v61 = vpop.f32.mrf.mxu1  ;;  %v1486_v37 = vadd.f32 %v3078_v59, %v1308_v23  ;;  %v3817_v59 = vld [vmem:[%s3905_s6] ss:$0 sm:$0xff] }
 0x131   : > { %v3055_v60 = vpop.f32.mrf.mxu0 }
 0x132   : > { %v3079_v39 = vpop.f32.mrf.mxu1 }
 0x133   : > { %v1278_v36 = vpop.f32.mrf.mxu0 }
 0x134   : > { %v1456_v63 = vpop.f32.mrf.mxu1  ;;  %v1307_v49 = vadd.f32 %v1278_v36, %v1129_v32  ;;  %v3823_v36 = vld [vmem:[%s3901_s2] ss:$0 sm:$0xff] }
 0x135   : > { %v3058_v62 = vpop.f32.mrf.mxu0 }
 0x136   : > { %v3792_v1 = vpop.f32.mrf.mxu1  ;;  %v1485_v28 = vadd.f32 %v1456_v63, %v1307_v49 }
 0x137   : > { %3910 = vst [vmem:[#allocation4_spill] sm:$0xff] %v3792_v1  ;;  %v1291_v2 = vpop.f32.mrf.mxu0  ;;  %v1128_v1 = vadd.f32 %v1097_v48, %v949_v19 }
 0x138   : > { %v3794_v47 = vpop.f32.mrf.mxu1  ;;  %v1310_v52 = vadd.f32 %v1291_v2, %v1132_v41  ;;  %v3828_v2 = vld [vmem:[%s3906_s7] ss:$0 sm:$0xff] }
 0x139   : > { %3911 = vst [vmem:[#allocation5_spill] sm:$0xff] %v3794_v47  ;;  %v3059_v3 = vpop.f32.mrf.mxu0  ;;  %v1306_v30 = vadd.f32 %v1275_v58, %v1128_v1  ;;  %v3916_v58 = vld [vmem:[#allocation3_spill] sm:$0xff] }
 0x13a   : > { %v3796_v44 = vpop.f32.mrf.mxu1 }
 0x13b   : > { %3912 = vst [vmem:[#allocation6_spill] sm:$0xff] %v3796_v44  ;;  %v1294_v4 = vpop.f32.mrf.mxu0  ;;  %v952_v44 = vadd.f32 %v3007_v46, %v760_v18  ;;  %v1484_v48 = vadd.f32 %v1453_v61, %v1306_v30 }
 0x13c   : > { %v3798_v7 = vpop.f32.mrf.mxu1 }
 0x13d   : > { %3913 = vst [vmem:[#allocation7_spill] sm:$0xff] %v3798_v7  ;;  %v773_v7 = vadd.f32 %v2986_v14, %v2962_v34  ;;  %v1131_v29 = vadd.f32 %v3031_v40, %v952_v44  ;;  %v954_v34 = vadd.f32 %v937_v54, %v768_v45  ;;  %v1135_v40 = vadd.f32 %v3035_v55, %v956_v38 }
 0x13e   : > { %v3917_v53 = vld [vmem:[#allocation4_spill] sm:$0xff] }
 0x13f   : > { %v955_v26 = vadd.f32 %v3010_v50, %v773_v7  ;;  %v1309_v46 = vadd.f32 %v3055_v60, %v1131_v29  ;;  %v1133_v31 = vadd.f32 %v3916_v58, %v954_v34  ;;  %v1313_v23 = vadd.f32 %v3059_v3, %v1135_v40 }
 0x140   : > { %v3918_v3 = vld [vmem:[#allocation5_spill] sm:$0xff] }
 0x141   : > { %v1134_v16 = vadd.f32 %v3034_v33, %v955_v26  ;;  %v1487_v50 = vadd.f32 %v3079_v39, %v1309_v46  ;;  %v1311_v55 = vadd.f32 %v1294_v4, %v1133_v31  ;;  %v1488_v44 = vadd.f32 %v3918_v3, %v1310_v52  ;;  %v3834_v4 = vld [vmem:[%s3902_s3] ss:$0 sm:$0xff] }
 0x143   : > { %v1312_v43 = vadd.f32 %v3058_v62, %v1134_v16 }
 0x144   : > { %v3921_v12 = vld [vmem:[#allocation7_spill] sm:$0xff] }
 0x145   : > { %v1490_v60 = vadd.f32 %v3917_v53, %v1312_v43  ;;  %v1489_v22 = vadd.f32 %v3921_v12, %v1311_v55 }
 0x14d   : > { %v3102_v5 = vpop.f32.mrf.mxu0 }
 0x14e   : > { %v3126_v0 = vpop.f32.mrf.mxu1  ;;  %v1665_v35 = vadd.f32 %v3102_v5, %v1486_v37 }
 0x14f   : > { %v1632_v8 = vpop.f32.mrf.mxu0 }
 0x150   : > { %v1810_v9 = vpop.f32.mrf.mxu1  ;;  %v1663_v56 = vadd.f32 %v1632_v8, %v1484_v48  ;;  %v1843_v57 = vadd.f32 %v3126_v0, %v1665_v35  ;;  %v3919_v8 = vld [vmem:[#allocation6_spill] sm:$0xff] }
 0x151   : > { %v3103_v10 = vpop.f32.mrf.mxu0 }
 0x152   : > { %v3800_v13 = vpop.f32.mrf.mxu1  ;;  %v1666_v33 = vadd.f32 %v3103_v10, %v1487_v50  ;;  %v1841_v39 = vadd.f32 %v1810_v9, %v1663_v56  ;;  %v1491_v9 = vadd.f32 %v3919_v8, %v1313_v23 }
 0x153   : > { %3914 = vst [vmem:[#allocation8_spill] sm:$0xff] %v3800_v13  ;;  %v1635_v15 = vpop.f32.mrf.mxu0 }
 0x154   : > { %v3802_v20 = vpop.f32.mrf.mxu1  ;;  %v1664_v62 = vadd.f32 %v1635_v15, %v1485_v28 }
 0x155   : > { %v3106_v21 = vpop.f32.mrf.mxu0 }
 0x156   : > { %v3804_v47 = vpop.f32.mrf.mxu1  ;;  %v1669_v5 = vadd.f32 %v3106_v21, %v1490_v60  ;;  %v1842_v29 = vadd.f32 %v3802_v20, %v1664_v62 }
 0x157   : > { %v1648_v13 = vpop.f32.mrf.mxu0 }
 0x158   : > { %v3806_v27 = vpop.f32.mrf.mxu1  ;;  %v1667_v21 = vadd.f32 %v1648_v13, %v1488_v44  ;;  %v1847_v32 = vadd.f32 %v3804_v47, %v1669_v5 }
 0x159   : > { %v3107_v14 = vpop.f32.mrf.mxu0 }
 0x15a   : > { %v3809_v42 = vpop.f32.mrf.mxu1  ;;  %v3920_v10 = vld [vmem:[#allocation8_spill] sm:$0xff]  ;;  %v1670_v38 = vadd.f32 %v3107_v14, %v1491_v9  ;;  %v1845_v35 = vadd.f32 %v3806_v27, %v1667_v21 }
 0x15b   : > { %v1651_v51 = vpop.f32.mrf.mxu0  ;;  %v1844_v15 = vadd.f32 %v3920_v10, %v1666_v33 }
 0x15c   : > { %v3812_v54 = vpop.f32.mrf.mxu1  ;;  %v1668_v41 = vadd.f32 %v1651_v51, %v1489_v22  ;;  %v1848_v27 = vadd.f32 %v3809_v42, %v1670_v38 }
 0x16d   : > { %v3150_v61 = vpop.f32.mrf.mxu0 }
 0x16e   : > { %v2021_v63 = vadd.f32 %v3150_v61, %v1843_v57  ;;  %v3174_v1 = vpop.f32.mrf.mxu1  ;;  %v1846_v61 = vadd.f32 %v3812_v54, %v1668_v41 }
 0x16f   : > { %v2235_v7 = vmul.f32 %v3174_v1, %v3817_v59  ;;  %v1988_v0 = vpop.f32.mrf.mxu0 }
 0x170   : > { %v2036_v17 = vmul.f32 %v3823_v36, %v2021_v63  ;;  %v2019_v18 = vadd.f32 %v1988_v0, %v1841_v39  ;;  %v2195_v19 = vpop.f32.mrf.mxu1 }
 0x171   : > { %v2250_v24 = vadd.f32 %v3828_v2, %v2235_v7  ;;  %v2233_v26 = vmul.f32 %v3817_v59, %v2195_v19  ;;  %v3151_v25 = vpop.f32.mrf.mxu0 }
 0x172   : > { %v2051_v30 = vadd.f32 %v3834_v4, %v2036_v17  ;;  %v2034_v6 = vmul.f32 %v3823_v36, %v2019_v18  ;;  %v2022_v45 = vadd.f32 %v3151_v25, %v1844_v15  ;;  %v3175_v11 = vpop.f32.mrf.mxu1 }
 0x173   : > { %v2248_v37 = vadd.f32 %v3828_v2, %v2233_v26  ;;  %v2236_v13 = vmul.f32 %v3175_v11, %v3817_v59  ;;  %v1991_v46 = vpop.f32.mrf.mxu0 }
 0x174   : > { %v2258_v16 = vadd.f32 %v2250_v24, %v2051_v30  ;;  %v2049_v34 = vadd.f32 %v3834_v4, %v2034_v6  ;;  %v2037_v20 = vmul.f32 %v3823_v36, %v2022_v45  ;;  %v2020_v48 = vadd.f32 %v1991_v46, %v1842_v29  ;;  %v2198_v49 = vpop.f32.mrf.mxu1 }
 0x175   : > { %v2251_v47 = vadd.f32 %v3828_v2, %v2236_v13  ;;  %v2234_v14 = vmul.f32 %v3817_v59, %v2198_v49  ;;  %v3154_v43 = vpop.f32.mrf.mxu0 }
 0x176   : > { %v2266_v40 = vmax.f32 %v2258_v16, 0.0  ;;  %v2256_v50 = vadd.f32 %v2248_v37, %v2049_v34  ;;  %v2052_v56 = vadd.f32 %v3834_v4, %v2037_v20  ;;  %v2035_v58 = vmul.f32 %v3823_v36, %v2020_v48  ;;  %v3178_v31 = vpop.f32.mrf.mxu1 }
 0x177   : > { %v2249_v52 = vadd.f32 %v3828_v2, %v2234_v14  ;;  %v2025_v51 = vadd.f32 %v3154_v43, %v1847_v32  ;;  %v2239_v28 = vmul.f32 %v3178_v31, %v3817_v59  ;;  %v2004_v23 = vpop.f32.mrf.mxu0 }
 0x178   : > { %2274 = vst [vmem:[%s3856_s15 + $0x10] sm:$0xff] %v2266_v40  ;;  %v2264_v57 = vmax.f32 %v2256_v50, 0.0  ;;  %v2259_v33 = vadd.f32 %v2251_v47, %v2052_v56  ;;  %v2050_v53 = vadd.f32 %v3834_v4, %v2035_v58  ;;  %v2023_v60 = vadd.f32 %v2004_v23, %v1845_v35  ;;  %v2211_v55 = vpop.f32.mrf.mxu1 }
 0x179   : > { %v2040_v39 = vmul.f32 %v3823_v36, %v2025_v51  ;;  %v2254_v42 = vadd.f32 %v3828_v2, %v2239_v28  ;;  %v2237_v62 = vmul.f32 %v3817_v59, %v2211_v55  ;;  %v3155_v63 = vpop.f32.mrf.mxu0 }
 0x17a   : > { %2272 = vst [vmem:[%s3856_s15] sm:$0xff] %v2264_v57  ;;  %v2267_v1 = vmax.f32 %v2259_v33, 0.0  ;;  %v2257_v3 = vadd.f32 %v2249_v52, %v2050_v53  ;;  %v2038_v44 = vmul.f32 %v3823_v36, %v2023_v60  ;;  %v2026_v5 = vadd.f32 %v3155_v63, %v1848_v27  ;;  %v3179_v7 = vpop.f32.mrf.mxu1 }
 0x17b   : > { %v2055_v0 = vadd.f32 %v3834_v4, %v2040_v39  ;;  %v2252_v8 = vadd.f32 %v3828_v2, %v2237_v62  ;;  %v2240_v54 = vmul.f32 %v3179_v7, %v3817_v59  ;;  %v2007_v9 = vpop.f32.mrf.mxu0 }
 0x17c   : > { %2275 = vst [vmem:[%s3856_s15 + $0x18] sm:$0xff] %v2267_v1  ;;  %v2265_v10 = vmax.f32 %v2257_v3, 0.0  ;;  %v2053_v15 = vadd.f32 %v3834_v4, %v2038_v44  ;;  %v2041_v17 = vmul.f32 %v3823_v36, %v2026_v5  ;;  %v2024_v18 = vadd.f32 %v2007_v9, %v1846_v61  ;;  %v2214_v19 = vpop.f32.mrf.mxu1 }
 0x17d   : > { %v2262_v12 = vadd.f32 %v2254_v42, %v2055_v0  ;;  %v2238_v22 = vmul.f32 %v3817_v59, %v2214_v19  ;;  %v2255_v26 = vadd.f32 %v3828_v2, %v2240_v54 }
 0x17e   : > { %2273 = vst [vmem:[%s3856_s15 + $0x8] sm:$0xff] %v2265_v10  ;;  %v2260_v21 = vadd.f32 %v2252_v8, %v2053_v15  ;;  %v2056_v24 = vadd.f32 %v3834_v4, %v2041_v17  ;;  %v2039_v25 = vmul.f32 %v3823_v36, %v2024_v18 }
 0x17f   : > { %v2270_v29 = vmax.f32 %v2262_v12, 0.0  ;;  %v2253_v11 = vadd.f32 %v3828_v2, %v2238_v22 }
 0x180   : > { %v2268_v30 = vmax.f32 %v2260_v21, 0.0  ;;  %v2263_v6 = vadd.f32 %v2255_v26, %v2056_v24  ;;  %v2054_v45 = vadd.f32 %v3834_v4, %v2039_v25 }
 0x181   : > { %2278 = vst [vmem:[%s3856_s15 + $0x30] sm:$0xff] %v2270_v29 }
 0x182   : > { %2276 = vst [vmem:[%s3856_s15 + $0x20] sm:$0xff] %v2268_v30  ;;  %v2271_v32 = vmax.f32 %v2263_v6, 0.0  ;;  %v2261_v59 = vadd.f32 %v2253_v11, %v2054_v45 }
 0x184   : > { %2279 = vst [vmem:[%s3856_s15 + $0x38] sm:$0xff] %v2271_v32  ;;  %v2269_v38 = vmax.f32 %v2261_v59, 0.0 }
 0x186   : > { %2277 = vst [vmem:[%s3856_s15 + $0x28] sm:$0xff] %v2269_v38 }
 0x187 PF: > { %s18_s29 = sadd.s32 1, %s3307_s29   ;;  %s3922_s27 = smov %s3303_s28 }
 0x188   : > { %p15_p5 = scmp.ge.s32.totalorder %s18_s29, 4   ;;  %s3923_s28 = smov %s3925_s30 }
 0x18a   :  { %17 = sbr.rel (!%p15_p5) target bundleno = 2 (0x2), region = 113 }

</bundles_post_ra>
